<compile_context>
chip_gen: v5e
topology: v5e:2x2
jax: 0.10.0
libtpu: 0.0.40
codegen_flags: <defaults>
</compile_context>

<pallas_src>
import jax
import jax.numpy as jnp
from jax import lax
from jax.experimental import pallas as pl
from jax.experimental.pallas import tpu as pltpu


# ----------------------------------------------------------------------------- helpers
def _ceil_to(x, m):
    return ((x + m - 1) // m) * m


def _tile_bytes(shape, itemsize):
    """Rough physical VMEM bytes of a tile (last dim padded to 128 lanes, 2nd-last to 8)."""
    dims = list(shape)
    dims[-1] = _ceil_to(dims[-1], 128)
    if len(dims) >= 2:
        dims[-2] = _ceil_to(dims[-2], 8)
    n = 1
    for d in dims:
        n *= d
    return n * itemsize


def _vmem_budget_bytes():
    """Generation-aware VMEM limit: physical capacity minus headroom, capped at 100 MiB."""
    phys = 64 * 1024 * 1024          # safe fallback (v7x per-TC VMEM)
    try:
        phys = int(pltpu.get_tpu_info().vmem_capacity_bytes)
    except Exception:
        pass
    limit = min(phys - (16 << 20), 100 << 20)
    return max(limit, 32 << 20)


def _pick_h_tile(H, W, Cin, c_tile, limit_bytes, cd_size):
    """Largest divisor of H whose full pass-1 working set fits ~70% of the VMEM budget."""
    def usage(ht):
        b = 0
        b += 2 * _tile_bytes((1, H, W, Cin), cd_size)        # resident NHWC image (dbl-buffered)
        b += 2 * _tile_bytes((9, Cin, c_tile), cd_size)      # weight tile
        b += 2 * _tile_bytes((1, ht, W, c_tile), cd_size)    # conv output tile
        b += 2 * _tile_bytes((1, 1, 2, c_tile), 4)           # per-tile stats
        b += _tile_bytes((ht + 2, W + 2, Cin), cd_size)      # padded-slab scratch
        b += _tile_bytes((ht * W, c_tile), 4)                # f32 accumulator
        b += 2 * _tile_bytes((ht * W, Cin), cd_size)         # shifted tap staging
        return b

    best = None
    for cand in range(1, H + 1):
        if H % cand == 0 and usage(cand) <= int(limit_bytes * 0.7):
            best = cand
    if best is None:
        # TODO(synk): switch to halo'd manual-DMA row blocks so VMEM use is independent of H*W.
        best = 1
    return best


def _pick_row_block(M, C, limit_bytes, in_itemsize):
    """Row-block size for the pass-2 elementwise sweep over the flat (M, C) conv slab."""
    per_row = 2 * _ceil_to(C, 128) * in_itemsize + 2 * _ceil_to(C, 128) * 4
    max_rows = max(8, int((limit_bytes * 0.6) // per_row))
    max_rows = min(max_rows, 8192, M)
    best = None
    for cand in range(1, max_rows + 1):
        if M % cand == 0 and (cand % 8 == 0 or cand == M):
            best = cand
    if best is None:
        best = M                      # full slab as one (layout-legal) block
    return best


# ----------------------------------------------------------------------------- wrapper
def block_forward(x_nchw, w_oihw, gamma, beta, *, h_tile=None, c_tile=None,
                  compute_dtype=jnp.bfloat16, eps=1e-5):
    """Conv3x3(stride 1, pad 1, no bias) -> BatchNorm2d (batch stats) -> ReLU.

    x_nchw: (N, Cin, H, W) float32.  Returns (N, Cout, H, W) float32.
    compute_dtype controls the MXU input dtype and the conv intermediate storage
    (bf16 by default; accumulation is always f32).
    """
    N, Cin, H, W = x_nchw.shape
    Cout = w_oihw.shape[0]
    cd = jnp.dtype(compute_dtype)
    cd_size = cd.itemsize

    # Lane-dense, MXU-native Cout tiling (256 for v6e/v7x; pass c_tile=128 on v5e).
    if c_tile is None:
        c_tile = min(256, _ceil_to(Cout, 128))
    c_tile = _ceil_to(c_tile, 128)
    Cout_p = _ceil_to(Cout, c_tile)
    n_c = Cout_p // c_tile

    vmem_limit = _vmem_budget_bytes()
    if h_tile is None:
        h_tile = _pick_h_tile(H, W, Cin, c_tile, vmem_limit, cd_size)
    # TODO(synk): drop the divisor requirement via cdiv + masked last row tile (H=7/14 stages).
    assert H % h_tile == 0, "h_tile must divide H"
    ht = h_tile
    n_t = H // ht

    # Layout glue: NCHW -> NHWC + bf16 cast in one fused HBM pass.  No HBM zero-pad: the
    # halo is built per row tile inside the kernel's VMEM scratch.
    x_nhwc = jnp.transpose(x_nchw, (0, 2, 3, 1)).astype(cd)                     # (N, H, W, Cin)
    w9 = jnp.transpose(w_oihw, (2, 3, 1, 0)).reshape(9, Cin, Cout)              # (tap, Cin, Cout)
    w9 = jnp.pad(w9, ((0, 0), (0, 0), (0, Cout_p - Cout))).astype(cd)           # lane-dense Cout

    # ------------------------------------------------------------------ pass 1 kernel
    def conv_stats_kernel(x_ref, w_ref, conv_ref, stats_ref, xpad_ref):
        # x_ref:    (1, H, W, Cin)      unpadded NHWC image, resident per batch element
        # w_ref:    (9, Cin, c_tile)    per-tap weights, resident across the row-tile sweep
        # conv_ref: (1, ht, W, c_tile)  raw conv tile (compute dtype, lane-dense channels)
        # stats_ref:(1, 1, 2, c_tile)   per-tile per-channel [sum, sum-of-squares] (f32)
        # xpad_ref: (ht+2, W+2, Cin)    VMEM scratch: zero-padded input slab for this row tile
        t = pl.program_id(1)
        c = pl.program_id(2)
        build = c == 0                       # slab depends only on (n, t); rebuild once per tile
        r0 = t * ht

        @pl.when(build)
        def _zero():
            xpad_ref[...] = jnp.zeros_like(xpad_ref)

        if n_t == 1:
            @pl.when(build)
            def _copy():
                xpad_ref[1:ht + 1, 1:W + 1, :] = x_ref[0]
        else:
            @pl.when(jnp.logical_and(build, t == 0))
            def _copy_first():
                xpad_ref[1:, 1:W + 1, :] = x_ref[0, pl.ds(0, ht + 1)]

            @pl.when(jnp.logical_and(build, t == n_t - 1))
            def _copy_last():
                xpad_ref[:ht + 1, 1:W + 1, :] = x_ref[0, pl.ds(r0 - 1, ht + 1)]

            if n_t > 2:
                @pl.when(jnp.logical_and(build,
                                         jnp.logical_and(t > 0, t < n_t - 1)))
                def _copy_mid():
                    xpad_ref[:, 1:W + 1, :] = x_ref[0, pl.ds(r0 - 1, ht + 2)]

        # 3x3 conv as 9 accumulating MXU matmuls (K = Cin) on shifted views of the slab.
        # No materialized im2col, no in-kernel dtype casts of the activations.
        acc = jnp.zeros((ht * W, c_tile), jnp.float32)
        for dy in range(3):
            for dx in range(3):
                lhs = xpad_ref[dy:dy + ht, dx:dx + W, :].reshape(ht * W, Cin)
                acc = acc + jnp.dot(lhs, w_ref[dy * 3 + dx],
                                    preferred_element_type=jnp.float32)

        conv_ref[...] = acc.reshape(1, ht, W, c_tile).astype(conv_ref.dtype)

        # Fused per-tile BN batch statistics from the f32 accumulator (single sweep).
        s = jnp.sum(acc, axis=0, keepdims=True)                    # (1, c_tile)
        ss = jnp.sum(acc * acc, axis=0, keepdims=True)             # (1, c_tile)
        stats_ref[...] = jnp.concatenate([s, ss], axis=0).reshape(1, 1, 2, c_tile)

    cparams = pltpu.CompilerParams(
        dimension_semantics=("parallel", "parallel", "arbitrary"),  # (n, t) megacore; c sequential
        vmem_limit_bytes=vmem_limit,
    )

    conv_full, stats = pl.pallas_call(
        conv_stats_kernel,
        grid=(N, n_t, n_c),
        out_shape=(
            jax.ShapeDtypeStruct((N, H, W, Cout_p), cd),
            jax.ShapeDtypeStruct((N, n_t, 2, Cout_p), jnp.float32),
        ),
        in_specs=[
            # Whole (unpadded) image per batch element, resident across its (t, c) sweep.
            pl.BlockSpec((1, H, W, Cin), lambda n, t, c: (n, 0, 0, 0)),
            pl.BlockSpec((9, Cin, c_tile), lambda n, t, c: (0, 0, c)),
        ],
        out_specs=(
            pl.BlockSpec((1, ht, W, c_tile), lambda n, t, c: (n, t, 0, c)),
            pl.BlockSpec((1, 1, 2, c_tile), lambda n, t, c: (n, t, 0, c)),
        ),
        scratch_shapes=[pltpu.VMEM((ht + 2, W + 2, Cin), cd)],
        compiler_params=cparams,
    )(x_nhwc, w9)

    # ---- Global BN statistics (tiny per-channel arrays; plain JAX, f32).
    # TODO(synk): shifted sum-of-squares (per-channel pivot) for very large N*H*W.
    cnt = jnp.float32(N * H * W)
    s_tot = jnp.sum(stats[:, :, 0, :], axis=(0, 1))                 # (Cout_p,)
    ss_tot = jnp.sum(stats[:, :, 1, :], axis=(0, 1))
    mean = s_tot / cnt
    var = jnp.maximum(ss_tot / cnt - mean * mean, 0.0)              # biased (train-mode) variance
    inv = lax.rsqrt(var + eps)
    gamma_p = jnp.pad(gamma.astype(jnp.float32), (0, Cout_p - Cout))
    beta_p = jnp.pad(beta.astype(jnp.float32), (0, Cout_p - Cout))
    scale = (gamma_p * inv).reshape(1, Cout_p)
    shift = (beta_p - mean * gamma_p * inv).reshape(1, Cout_p)

    # ------------------------------------------------------------------ pass 2 kernel
    # Pure HBM-roofline elementwise sweep: flat (N*H*W, Cout_p) view, big lane-dense row blocks.
    def bn_relu_kernel(conv_ref, scale_ref, shift_ref, o_ref):
        y = conv_ref[...].astype(jnp.float32) * scale_ref[...] + shift_ref[...]
        o_ref[...] = jnp.maximum(y, 0.0).astype(o_ref.dtype)

    M = N * H * W
    rb = _pick_row_block(M, Cout_p, vmem_limit, cd_size)
    conv_flat = conv_full.reshape(M, Cout_p)                        # free (collapse leading dims)

    out_flat = pl.pallas_call(
        bn_relu_kernel,
        grid=(M // rb,),
        out_shape=jax.ShapeDtypeStruct((M, Cout_p), jnp.float32),
        in_specs=[
            pl.BlockSpec((rb, Cout_p), lambda i: (i, 0)),
            pl.BlockSpec((1, Cout_p), lambda i: (0, 0)),
            pl.BlockSpec((1, Cout_p), lambda i: (0, 0)),
        ],
        out_specs=pl.BlockSpec((rb, Cout_p), lambda i: (i, 0)),
        compiler_params=pltpu.CompilerParams(
            dimension_semantics=("parallel",), vmem_limit_bytes=vmem_limit),
    )(conv_flat, scale, shift)

    out = out_flat.reshape(N, H, W, Cout_p)[:, :, :, :Cout]          # drop channel padding
    return jnp.transpose(out, (0, 3, 1, 2))                          # NHWC -> NCHW


# ----------------------------------------------------------------------------- reference
def reference_forward(x_nchw, w_oihw, gamma, beta):
    """Pure-JAX reference matching PyTorch semantics (train-mode BN)."""
    conv = lax.conv_general_dilated(
        x_nchw, w_oihw, window_strides=(1, 1), padding="SAME",
        dimension_numbers=("NCHW", "OIHW", "NCHW"))
    mean = jnp.mean(conv, axis=(0, 2, 3), keepdims=True)
    var = jnp.mean((conv - mean) ** 2, axis=(0, 2, 3), keepdims=True)
    y = (conv - mean) * lax.rsqrt(var + 1e-5)
    y = y * gamma.reshape(1, -1, 1, 1) + beta.reshape(1, -1, 1, 1)
    return jnp.maximum(y, 0.0)


if __name__ == "__main__":
    key = jax.random.PRNGKey(0)
    k_x, k_w = jax.random.split(key)

    N, Cin, H, W = 2, 4, 16, 16
    Cout = 8

    x = jax.random.normal(k_x, (N, Cin, H, W), dtype=jnp.float32)
    fan_in = Cin * 3 * 3
    w = jax.random.normal(k_w, (Cout, Cin, 3, 3), dtype=jnp.float32) / jnp.sqrt(fan_in)
    gamma = jnp.ones((Cout,), jnp.float32)   # BN weight default
    beta = jnp.zeros((Cout,), jnp.float32)   # BN bias default

    ref = reference_forward(x, w, gamma, beta)

    # Exactness check of the algorithm: f32 compute path; h_tile=8 -> n_t=2 exercises the
    # in-kernel halo construction (first/last row-tile branches) and the row-tile pipeline.
    fwd_f32 = jax.jit(lambda a, b, g, c: block_forward(
        a, b, g, c, h_tile=8, compute_dtype=jnp.float32))
    out_f32 = jax.block_until_ready(fwd_f32(x, w, gamma, beta))
    assert out_f32.shape == (N, Cout, H, W)
    err32 = float(jnp.max(jnp.abs(out_f32 - ref)))
    assert err32 < 2e-4, f"f32 path mismatch vs reference: max abs err = {err32}"

    # Default fast path: bf16 MXU inputs + bf16 conv intermediate (f32 accumulation).
    fwd_bf16 = jax.jit(lambda a, b, g, c: block_forward(a, b, g, c, h_tile=8))
    out_bf16 = jax.block_until_ready(fwd_bf16(x, w, gamma, beta))
    assert out_bf16.shape == (N, Cout, H, W)
    err16 = float(jnp.max(jnp.abs(out_bf16 - ref)))
    assert err16 < 8e-2, f"bf16 path mismatch vs reference: max abs err = {err16}"

    print("KERNEL_OK")
</pallas_src>

<mosaic_0001>
module attributes {stable_mosaic.version = 11 : i64} {
  func.func @conv_stats_kernel(%arg0: i32, %arg1: i32, %arg2: i32, %arg3: memref<1x16x16x4xf32, #tpu.memory_space<vmem>>, %arg4: memref<9x4x128xf32, #tpu.memory_space<vmem>>, %arg5: memref<1x8x16x128xf32, #tpu.memory_space<vmem>>, %arg6: memref<1x1x2x128xf32, #tpu.memory_space<vmem>>, %arg7: memref<10x18x4xf32, #tpu.memory_space<vmem>>) attributes {dimension_semantics = [#tpu.dimension_semantics<parallel>, #tpu.dimension_semantics<parallel>, #tpu.dimension_semantics<arbitrary>], iteration_bounds = array<i64: 2, 2, 1>, scalar_prefetch = 0 : i64, scratch_operands = 1 : i64, tpu.core_type = #tpu.core_type<tc>, window_params = [{transform_indices = @transform_0, window_bounds = array<i64: 1, 16, 16, 4>}, {transform_indices = @transform_1, window_bounds = array<i64: 9, 4, 128>}, {transform_indices = @transform_2, window_bounds = array<i64: 1, 8, 16, 128>}, {transform_indices = @transform_3, window_bounds = array<i64: 1, 1, 2, 128>}]} {
    %c0_i32 = arith.constant 0 : i32
    %0 = arith.cmpi eq, %arg2, %c0_i32 : i32
    %c8_i32 = arith.constant 8 : i32
    %1 = arith.muli %arg1, %c8_i32 : i32
    %2 = arith.extui %0 : i1 to i32
    %c0_i32_0 = arith.constant 0 : i32
    %3 = arith.cmpi ne, %2, %c0_i32_0 : i32
    scf.if %3 {
      %cst_68 = arith.constant 0.000000e+00 : f32
      %77 = vector.broadcast %cst_68 : f32 to vector<10x18x4xf32>
      %c0_69 = arith.constant 0 : index
      %c0_70 = arith.constant 0 : index
      %c0_71 = arith.constant 0 : index
      %78 = vector.load %arg7[%c0_69, %c0_70, %c0_71] : memref<10x18x4xf32, #tpu.memory_space<vmem>>, vector<10x18x4xf32>
      tpu.vector_store %arg7[%c0_69, %c0_70, %c0_71], %77 {strides = array<i32>} : memref<10x18x4xf32, #tpu.memory_space<vmem>>, vector<10x18x4xf32>,
    } else {
    }
    %c0_i32_1 = arith.constant 0 : i32
    %4 = arith.cmpi eq, %arg1, %c0_i32_1 : i32
    %5 = arith.andi %0, %4 : i1
    %6 = arith.extui %5 : i1 to i32
    %c0_i32_2 = arith.constant 0 : i32
    %7 = arith.cmpi ne, %6, %c0_i32_2 : i32
    scf.if %7 {
      %c0_68 = arith.constant 0 : index
      %c0_69 = arith.constant 0 : index
      %c0_70 = arith.constant 0 : index
      %c0_71 = arith.constant 0 : index
      %77 = vector.load %arg3[%c0_68, %c0_69, %c0_70, %c0_71] : memref<1x16x16x4xf32, #tpu.memory_space<vmem>>, vector<1x9x16x4xf32>
      %78 = vector.shape_cast %77 : vector<1x9x16x4xf32> to vector<9x16x4xf32>
      %c1_72 = arith.constant 1 : index
      %c1_73 = arith.constant 1 : index
      %c0_74 = arith.constant 0 : index
      %79 = vector.load %arg7[%c1_72, %c1_73, %c0_74] : memref<10x18x4xf32, #tpu.memory_space<vmem>>, vector<9x16x4xf32>
      tpu.vector_store %arg7[%c1_72, %c1_73, %c0_74], %78 {strides = array<i32>} : memref<10x18x4xf32, #tpu.memory_space<vmem>>, vector<9x16x4xf32>,
    } else {
    }
    %c1_i32 = arith.constant 1 : i32
    %8 = arith.cmpi eq, %arg1, %c1_i32 : i32
    %9 = arith.andi %0, %8 : i1
    %10 = arith.extui %9 : i1 to i32
    %c0_i32_3 = arith.constant 0 : i32
    %11 = arith.cmpi ne, %10, %c0_i32_3 : i32
    scf.if %11 {
      %c1_i32_68 = arith.constant 1 : i32
      %77 = arith.subi %1, %c1_i32_68 : i32
      %c0_69 = arith.constant 0 : index
      %78 = arith.index_cast %77 : i32 to index
      %c0_70 = arith.constant 0 : index
      %c0_71 = arith.constant 0 : index
      %79 = vector.load %arg3[%c0_69, %78, %c0_70, %c0_71] : memref<1x16x16x4xf32, #tpu.memory_space<vmem>>, vector<1x9x16x4xf32>
      %80 = vector.shape_cast %79 : vector<1x9x16x4xf32> to vector<9x16x4xf32>
      %c0_72 = arith.constant 0 : index
      %c1_73 = arith.constant 1 : index
      %c0_74 = arith.constant 0 : index
      %81 = vector.load %arg7[%c0_72, %c1_73, %c0_74] : memref<10x18x4xf32, #tpu.memory_space<vmem>>, vector<9x16x4xf32>
      tpu.vector_store %arg7[%c0_72, %c1_73, %c0_74], %80 {strides = array<i32>} : memref<10x18x4xf32, #tpu.memory_space<vmem>>, vector<9x16x4xf32>,
    } else {
    }
    %cst = arith.constant 0.000000e+00 : f32
    %12 = vector.broadcast %cst : f32 to vector<128x128xf32>
    %c0 = arith.constant 0 : index
    %c0_4 = arith.constant 0 : index
    %c0_5 = arith.constant 0 : index
    %13 = vector.load %arg7[%c0, %c0_4, %c0_5] : memref<10x18x4xf32, #tpu.memory_space<vmem>>, vector<8x16x4xf32>
    %14 = vector.shape_cast %13 : vector<8x16x4xf32> to vector<128x4xf32>
    %c0_6 = arith.constant 0 : index
    %c0_7 = arith.constant 0 : index
    %c0_8 = arith.constant 0 : index
    %15 = vector.load %arg4[%c0_6, %c0_7, %c0_8] : memref<9x4x128xf32, #tpu.memory_space<vmem>>, vector<1x4x128xf32>
    %16 = vector.shape_cast %15 : vector<1x4x128xf32> to vector<4x128xf32>
    %cst_9 = arith.constant dense<0.000000e+00> : vector<128x128xf32>
    %17 = tpu.matmul %14, %16, %cst_9 {dimension_numbers = #tpu.dot_dimension_numbers<[1], [0], [0], [1], [0, 0, 1, 1], [], []>} : vector<128x4xf32>, vector<4x128xf32>, vector<128x128xf32> -> vector<128x128xf32>
    %18 = arith.addf %12, %17 : vector<128x128xf32>
    %c0_10 = arith.constant 0 : index
    %c1 = arith.constant 1 : index
    %c0_11 = arith.constant 0 : index
    %19 = vector.load %arg7[%c0_10, %c1, %c0_11] : memref<10x18x4xf32, #tpu.memory_space<vmem>>, vector<8x16x4xf32>
    %20 = vector.shape_cast %19 : vector<8x16x4xf32> to vector<128x4xf32>
    %c1_12 = arith.constant 1 : index
    %c0_13 = arith.constant 0 : index
    %c0_14 = arith.constant 0 : index
    %21 = vector.load %arg4[%c1_12, %c0_13, %c0_14] : memref<9x4x128xf32, #tpu.memory_space<vmem>>, vector<1x4x128xf32>
    %22 = vector.shape_cast %21 : vector<1x4x128xf32> to vector<4x128xf32>
    %cst_15 = arith.constant dense<0.000000e+00> : vector<128x128xf32>
    %23 = tpu.matmul %20, %22, %cst_15 {dimension_numbers = #tpu.dot_dimension_numbers<[1], [0], [0], [1], [0, 0, 1, 1], [], []>} : vector<128x4xf32>, vector<4x128xf32>, vector<128x128xf32> -> vector<128x128xf32>
    %24 = arith.addf %18, %23 : vector<128x128xf32>
    %c0_16 = arith.constant 0 : index
    %c2 = arith.constant 2 : index
    %c0_17 = arith.constant 0 : index
    %25 = vector.load %arg7[%c0_16, %c2, %c0_17] : memref<10x18x4xf32, #tpu.memory_space<vmem>>, vector<8x16x4xf32>
    %26 = vector.shape_cast %25 : vector<8x16x4xf32> to vector<128x4xf32>
    %c2_18 = arith.constant 2 : index
    %c0_19 = arith.constant 0 : index
    %c0_20 = arith.constant 0 : index
    %27 = vector.load %arg4[%c2_18, %c0_19, %c0_20] : memref<9x4x128xf32, #tpu.memory_space<vmem>>, vector<1x4x128xf32>
    %28 = vector.shape_cast %27 : vector<1x4x128xf32> to vector<4x128xf32>
    %cst_21 = arith.constant dense<0.000000e+00> : vector<128x128xf32>
    %29 = tpu.matmul %26, %28, %cst_21 {dimension_numbers = #tpu.dot_dimension_numbers<[1], [0], [0], [1], [0, 0, 1, 1], [], []>} : vector<128x4xf32>, vector<4x128xf32>, vector<128x128xf32> -> vector<128x128xf32>
    %30 = arith.addf %24, %29 : vector<128x128xf32>
    %c1_22 = arith.constant 1 : index
    %c0_23 = arith.constant 0 : index
    %c0_24 = arith.constant 0 : index
    %31 = vector.load %arg7[%c1_22, %c0_23, %c0_24] : memref<10x18x4xf32, #tpu.memory_space<vmem>>, vector<8x16x4xf32>
    %32 = vector.shape_cast %31 : vector<8x16x4xf32> to vector<128x4xf32>
    %c3 = arith.constant 3 : index
    %c0_25 = arith.constant 0 : index
    %c0_26 = arith.constant 0 : index
    %33 = vector.load %arg4[%c3, %c0_25, %c0_26] : memref<9x4x128xf32, #tpu.memory_space<vmem>>, vector<1x4x128xf32>
    %34 = vector.shape_cast %33 : vector<1x4x128xf32> to vector<4x128xf32>
    %cst_27 = arith.constant dense<0.000000e+00> : vector<128x128xf32>
    %35 = tpu.matmul %32, %34, %cst_27 {dimension_numbers = #tpu.dot_dimension_numbers<[1], [0], [0], [1], [0, 0, 1, 1], [], []>} : vector<128x4xf32>, vector<4x128xf32>, vector<128x128xf32> -> vector<128x128xf32>
    %36 = arith.addf %30, %35 : vector<128x128xf32>
    %c1_28 = arith.constant 1 : index
    %c1_29 = arith.constant 1 : index
    %c0_30 = arith.constant 0 : index
    %37 = vector.load %arg7[%c1_28, %c1_29, %c0_30] : memref<10x18x4xf32, #tpu.memory_space<vmem>>, vector<8x16x4xf32>
    %38 = vector.shape_cast %37 : vector<8x16x4xf32> to vector<128x4xf32>
    %c4 = arith.constant 4 : index
    %c0_31 = arith.constant 0 : index
    %c0_32 = arith.constant 0 : index
    %39 = vector.load %arg4[%c4, %c0_31, %c0_32] : memref<9x4x128xf32, #tpu.memory_space<vmem>>, vector<1x4x128xf32>
    %40 = vector.shape_cast %39 : vector<1x4x128xf32> to vector<4x128xf32>
    %cst_33 = arith.constant dense<0.000000e+00> : vector<128x128xf32>
    %41 = tpu.matmul %38, %40, %cst_33 {dimension_numbers = #tpu.dot_dimension_numbers<[1], [0], [0], [1], [0, 0, 1, 1], [], []>} : vector<128x4xf32>, vector<4x128xf32>, vector<128x128xf32> -> vector<128x128xf32>
    %42 = arith.addf %36, %41 : vector<128x128xf32>
    %c1_34 = arith.constant 1 : index
    %c2_35 = arith.constant 2 : index
    %c0_36 = arith.constant 0 : index
    %43 = vector.load %arg7[%c1_34, %c2_35, %c0_36] : memref<10x18x4xf32, #tpu.memory_space<vmem>>, vector<8x16x4xf32>
    %44 = vector.shape_cast %43 : vector<8x16x4xf32> to vector<128x4xf32>
    %c5 = arith.constant 5 : index
    %c0_37 = arith.constant 0 : index
    %c0_38 = arith.constant 0 : index
    %45 = vector.load %arg4[%c5, %c0_37, %c0_38] : memref<9x4x128xf32, #tpu.memory_space<vmem>>, vector<1x4x128xf32>
    %46 = vector.shape_cast %45 : vector<1x4x128xf32> to vector<4x128xf32>
    %cst_39 = arith.constant dense<0.000000e+00> : vector<128x128xf32>
    %47 = tpu.matmul %44, %46, %cst_39 {dimension_numbers = #tpu.dot_dimension_numbers<[1], [0], [0], [1], [0, 0, 1, 1], [], []>} : vector<128x4xf32>, vector<4x128xf32>, vector<128x128xf32> -> vector<128x128xf32>
    %48 = arith.addf %42, %47 : vector<128x128xf32>
    %c2_40 = arith.constant 2 : index
    %c0_41 = arith.constant 0 : index
    %c0_42 = arith.constant 0 : index
    %49 = vector.load %arg7[%c2_40, %c0_41, %c0_42] : memref<10x18x4xf32, #tpu.memory_space<vmem>>, vector<8x16x4xf32>
    %50 = vector.shape_cast %49 : vector<8x16x4xf32> to vector<128x4xf32>
    %c6 = arith.constant 6 : index
    %c0_43 = arith.constant 0 : index
    %c0_44 = arith.constant 0 : index
    %51 = vector.load %arg4[%c6, %c0_43, %c0_44] : memref<9x4x128xf32, #tpu.memory_space<vmem>>, vector<1x4x128xf32>
    %52 = vector.shape_cast %51 : vector<1x4x128xf32> to vector<4x128xf32>
    %cst_45 = arith.constant dense<0.000000e+00> : vector<128x128xf32>
    %53 = tpu.matmul %50, %52, %cst_45 {dimension_numbers = #tpu.dot_dimension_numbers<[1], [0], [0], [1], [0, 0, 1, 1], [], []>} : vector<128x4xf32>, vector<4x128xf32>, vector<128x128xf32> -> vector<128x128xf32>
    %54 = arith.addf %48, %53 : vector<128x128xf32>
    %c2_46 = arith.constant 2 : index
    %c1_47 = arith.constant 1 : index
    %c0_48 = arith.constant 0 : index
    %55 = vector.load %arg7[%c2_46, %c1_47, %c0_48] : memref<10x18x4xf32, #tpu.memory_space<vmem>>, vector<8x16x4xf32>
    %56 = vector.shape_cast %55 : vector<8x16x4xf32> to vector<128x4xf32>
    %c7 = arith.constant 7 : index
    %c0_49 = arith.constant 0 : index
    %c0_50 = arith.constant 0 : index
    %57 = vector.load %arg4[%c7, %c0_49, %c0_50] : memref<9x4x128xf32, #tpu.memory_space<vmem>>, vector<1x4x128xf32>
    %58 = vector.shape_cast %57 : vector<1x4x128xf32> to vector<4x128xf32>
    %cst_51 = arith.constant dense<0.000000e+00> : vector<128x128xf32>
    %59 = tpu.matmul %56, %58, %cst_51 {dimension_numbers = #tpu.dot_dimension_numbers<[1], [0], [0], [1], [0, 0, 1, 1], [], []>} : vector<128x4xf32>, vector<4x128xf32>, vector<128x128xf32> -> vector<128x128xf32>
    %60 = arith.addf %54, %59 : vector<128x128xf32>
    %c2_52 = arith.constant 2 : index
    %c2_53 = arith.constant 2 : index
    %c0_54 = arith.constant 0 : index
    %61 = vector.load %arg7[%c2_52, %c2_53, %c0_54] : memref<10x18x4xf32, #tpu.memory_space<vmem>>, vector<8x16x4xf32>
    %62 = vector.shape_cast %61 : vector<8x16x4xf32> to vector<128x4xf32>
    %c8 = arith.constant 8 : index
    %c0_55 = arith.constant 0 : index
    %c0_56 = arith.constant 0 : index
    %63 = vector.load %arg4[%c8, %c0_55, %c0_56] : memref<9x4x128xf32, #tpu.memory_space<vmem>>, vector<1x4x128xf32>
    %64 = vector.shape_cast %63 : vector<1x4x128xf32> to vector<4x128xf32>
    %cst_57 = arith.constant dense<0.000000e+00> : vector<128x128xf32>
    %65 = tpu.matmul %62, %64, %cst_57 {dimension_numbers = #tpu.dot_dimension_numbers<[1], [0], [0], [1], [0, 0, 1, 1], [], []>} : vector<128x4xf32>, vector<4x128xf32>, vector<128x128xf32> -> vector<128x128xf32>
    %66 = arith.addf %60, %65 : vector<128x128xf32>
    %67 = vector.shape_cast %66 : vector<128x128xf32> to vector<1x8x16x128xf32>
    %c0_58 = arith.constant 0 : index
    %c0_59 = arith.constant 0 : index
    %c0_60 = arith.constant 0 : index
    %c0_61 = arith.constant 0 : index
    %68 = vector.load %arg5[%c0_58, %c0_59, %c0_60, %c0_61] : memref<1x8x16x128xf32, #tpu.memory_space<vmem>>, vector<1x8x16x128xf32>
    tpu.vector_store %arg5[%c0_58, %c0_59, %c0_60, %c0_61], %67 {strides = array<i32>} : memref<1x8x16x128xf32, #tpu.memory_space<vmem>>, vector<1x8x16x128xf32>,
    %cst_62 = arith.constant dense<0.000000e+00> : vector<128xf32>
    %69 = vector.multi_reduction <add>, %66, %cst_62 [0] : vector<128x128xf32> to vector<128xf32>
    %70 = vector.shape_cast %69 : vector<128xf32> to vector<1x128xf32>
    %71 = arith.mulf %66, %66 : vector<128x128xf32>
    %cst_63 = arith.constant dense<0.000000e+00> : vector<128xf32>
    %72 = vector.multi_reduction <add>, %71, %cst_63 [0] : vector<128x128xf32> to vector<128xf32>
    %73 = vector.shape_cast %72 : vector<128xf32> to vector<1x128xf32>
    %74 = tpu.concatenate %70, %73 in 0 : vector<1x128xf32>, vector<1x128xf32> -> vector<2x128xf32>
    %75 = vector.shape_cast %74 : vector<2x128xf32> to vector<1x1x2x128xf32>
    %c0_64 = arith.constant 0 : index
    %c0_65 = arith.constant 0 : index
    %c0_66 = arith.constant 0 : index
    %c0_67 = arith.constant 0 : index
    %76 = vector.load %arg6[%c0_64, %c0_65, %c0_66, %c0_67] : memref<1x1x2x128xf32, #tpu.memory_space<vmem>>, vector<1x1x2x128xf32>
    tpu.vector_store %arg6[%c0_64, %c0_65, %c0_66, %c0_67], %75 {strides = array<i32>} : memref<1x1x2x128xf32, #tpu.memory_space<vmem>>, vector<1x1x2x128xf32>,
    return
  }
  func.func @transform_0(%arg0: i32, %arg1: i32, %arg2: i32) -> (i32, i32, i32, i32) {
    %c0_i32 = arith.constant 0 : i32
    %c0_i32_0 = arith.constant 0 : i32
    %c0_i32_1 = arith.constant 0 : i32
    %c0_i32_2 = arith.constant 0 : i32
    return %arg0, %c0_i32, %c0_i32_0, %c0_i32_1 : i32, i32, i32, i32
  }
  func.func @transform_1(%arg0: i32, %arg1: i32, %arg2: i32) -> (i32, i32, i32) {
    %c0_i32 = arith.constant 0 : i32
    %c0_i32_0 = arith.constant 0 : i32
    %c0_i32_1 = arith.constant 0 : i32
    return %c0_i32, %c0_i32_0, %arg2 : i32, i32, i32
  }
  func.func @transform_2(%arg0: i32, %arg1: i32, %arg2: i32) -> (i32, i32, i32, i32) {
    %c0_i32 = arith.constant 0 : i32
    %c0_i32_0 = arith.constant 0 : i32
    return %arg0, %arg1, %c0_i32, %arg2 : i32, i32, i32, i32
  }
  func.func @transform_3(%arg0: i32, %arg1: i32, %arg2: i32) -> (i32, i32, i32, i32) {
    %c0_i32 = arith.constant 0 : i32
    %c0_i32_0 = arith.constant 0 : i32
    return %arg0, %arg1, %c0_i32, %arg2 : i32, i32, i32, i32
  }
}

module attributes {stable_mosaic.version = 11 : i64} {
  func.func @bn_relu_kernel(%arg0: i32, %arg1: memref<512x128xf32, #tpu.memory_space<vmem>>, %arg2: memref<1x128xf32, #tpu.memory_space<vmem>>, %arg3: memref<1x128xf32, #tpu.memory_space<vmem>>, %arg4: memref<512x128xf32, #tpu.memory_space<vmem>>) attributes {dimension_semantics = [#tpu.dimension_semantics<parallel>], iteration_bounds = array<i64: 1>, scalar_prefetch = 0 : i64, scratch_operands = 0 : i64, tpu.core_type = #tpu.core_type<tc>, window_params = [{transform_indices = @transform_0, window_bounds = array<i64: 512, 128>}, {pipeline_mode = #tpu.pipeline_mode<synchronous>, transform_indices = @transform_1, window_bounds = array<i64: 1, 128>}, {pipeline_mode = #tpu.pipeline_mode<synchronous>, transform_indices = @transform_2, window_bounds = array<i64: 1, 128>}, {transform_indices = @transform_3, window_bounds = array<i64: 512, 128>}]} {
    %c0 = arith.constant 0 : index
    %c0_0 = arith.constant 0 : index
    %0 = vector.load %arg1[%c0, %c0_0] : memref<512x128xf32, #tpu.memory_space<vmem>>, vector<512x128xf32>
    %c0_1 = arith.constant 0 : index
    %c0_2 = arith.constant 0 : index
    %1 = vector.load %arg2[%c0_1, %c0_2] : memref<1x128xf32, #tpu.memory_space<vmem>>, vector<1x128xf32>
    %2 = vector.broadcast %1 : vector<1x128xf32> to vector<512x128xf32>
    %3 = arith.mulf %0, %2 : vector<512x128xf32>
    %c0_3 = arith.constant 0 : index
    %c0_4 = arith.constant 0 : index
    %4 = vector.load %arg3[%c0_3, %c0_4] : memref<1x128xf32, #tpu.memory_space<vmem>>, vector<1x128xf32>
    %5 = vector.broadcast %4 : vector<1x128xf32> to vector<512x128xf32>
    %6 = arith.addf %3, %5 : vector<512x128xf32>
    %cst = arith.constant 0.000000e+00 : f32
    %7 = vector.broadcast %cst : f32 to vector<512x128xf32>
    %8 = arith.maximumf %6, %7 : vector<512x128xf32>
    %c0_5 = arith.constant 0 : index
    %c0_6 = arith.constant 0 : index
    %9 = vector.load %arg4[%c0_5, %c0_6] : memref<512x128xf32, #tpu.memory_space<vmem>>, vector<512x128xf32>
    tpu.vector_store %arg4[%c0_5, %c0_6], %8 {strides = array<i32>} : memref<512x128xf32, #tpu.memory_space<vmem>>, vector<512x128xf32>,
    return
  }
  func.func @transform_0(%arg0: i32) -> (i32, i32) {
    %c0_i32 = arith.constant 0 : i32
    %c0_i32_0 = arith.constant 0 : i32
    return %arg0, %c0_i32 : i32, i32
  }
  func.func @transform_1(%arg0: i32) -> (i32, i32) {
    %c0_i32 = arith.constant 0 : i32
    %c0_i32_0 = arith.constant 0 : i32
    %c0_i32_1 = arith.constant 0 : i32
    return %c0_i32, %c0_i32_0 : i32, i32
  }
  func.func @transform_2(%arg0: i32) -> (i32, i32) {
    %c0_i32 = arith.constant 0 : i32
    %c0_i32_0 = arith.constant 0 : i32
    %c0_i32_1 = arith.constant 0 : i32
    return %c0_i32, %c0_i32_0 : i32, i32
  }
  func.func @transform_3(%arg0: i32) -> (i32, i32) {
    %c0_i32 = arith.constant 0 : i32
    %c0_i32_0 = arith.constant 0 : i32
    return %arg0, %c0_i32 : i32, i32
  }
}

</mosaic_0001>

<bundles_post_ra>
// kernel: _lambda_.3
= control target key start
LH: loop header
LB: loop body
LE: loop exit
PB: predicated region body
PF: predicated region fallthrough
CT: control target
= control target key end

     0   :  { %s893_s0 = inlined_call_operand.vmem [shape: f32[512,128], index: 0, kind: input, shape index: {}]   ;;  %s894_s1 = inlined_call_operand.vmem [shape: f32[1,128], index: 1, kind: input, shape index: {}]   ;;  %s895_s2 = inlined_call_operand.vmem [shape: f32[1,128], index: 2, kind: input, shape index: {}]   ;;  %s896_s3 = inlined_call_operand.vmem [shape: f32[512,128], index: 3, kind: output, shape index: {}]  }
   0x1   :  { %v14_v0 = vld [vmem:[%s893_s0] sm:$0xff]  ;;  %v15_v3 = vld [vmem:[%s893_s0 + $0x8] sm:$0xff]  ;;  %v16_v6 = vld [vmem:[%s893_s0 + $0x10] sm:$0xff] }
   0x2   :  { %v374_v1 = vld [vmem:[%s894_s1] ss:$0 sm:$0xff]  ;;  %v17_v7 = vld [vmem:[%s893_s0 + $0x18] sm:$0xff]  ;;  %v19_v12 = vld [vmem:[%s893_s0 + $0x28] sm:$0xff] }
   0x3   :  { %v379_v2 = vld [vmem:[%s895_s2] ss:$0 sm:$0xff]  ;;  %v82_v4 = vmul.f32 %v374_v1, %v14_v0  ;;  %v83_v5 = vmul.f32 %v374_v1, %v15_v3  ;;  %v84_v9 = vmul.f32 %v374_v1, %v16_v6  ;;  %v85_v10 = vmul.f32 %v374_v1, %v17_v7  ;;  %v20_v13 = vld [vmem:[%s893_s0 + $0x30] sm:$0xff]  ;;  %v21_v14 = vld [vmem:[%s893_s0 + $0x38] sm:$0xff] }
   0x4   :  { %v18_v8 = vld [vmem:[%s893_s0 + $0x20] sm:$0xff]  ;;  %v87_v17 = vmul.f32 %v374_v1, %v19_v12  ;;  %v88_v18 = vmul.f32 %v374_v1, %v20_v13  ;;  %v89_v22 = vmul.f32 %v374_v1, %v21_v14  ;;  %v23_v24 = vld [vmem:[%s893_s0 + $0x48] sm:$0xff]  ;;  %v24_v29 = vld [vmem:[%s893_s0 + $0x50] sm:$0xff] }
   0x5   :  { %v86_v11 = vmul.f32 %v374_v1, %v18_v8  ;;  %v150_v15 = vadd.f32 %v379_v2, %v82_v4  ;;  %v151_v16 = vadd.f32 %v379_v2, %v83_v5  ;;  %v152_v19 = vadd.f32 %v379_v2, %v84_v9  ;;  %v22_v23 = vld [vmem:[%s893_s0 + $0x40] sm:$0xff]  ;;  %v25_v30 = vld [vmem:[%s893_s0 + $0x58] sm:$0xff]  ;;  %v27_v35 = vld [vmem:[%s893_s0 + $0x68] sm:$0xff] }
   0x6   :  { %v153_v20 = vadd.f32 %v379_v2, %v85_v10  ;;  %v155_v27 = vadd.f32 %v379_v2, %v87_v17  ;;  %v156_v28 = vadd.f32 %v379_v2, %v88_v18  ;;  %v26_v31 = vld [vmem:[%s893_s0 + $0x60] sm:$0xff]  ;;  %v157_v34 = vadd.f32 %v379_v2, %v89_v22  ;;  %v28_v36 = vld [vmem:[%s893_s0 + $0x70] sm:$0xff]  ;;  %v29_v41 = vld [vmem:[%s893_s0 + $0x78] sm:$0xff] }
   0x7   :  { %v154_v21 = vadd.f32 %v379_v2, %v86_v11  ;;  %v214_v25 = vmax.f32 %v150_v15, 0.0  ;;  %v215_v26 = vmax.f32 %v151_v16, 0.0  ;;  %v216_v32 = vmax.f32 %v152_v19, 0.0  ;;  %v30_v54 = vld [vmem:[%s893_s0 + $0x80] sm:$0xff]  ;;  %v31_v55 = vld [vmem:[%s893_s0 + $0x88] sm:$0xff]  ;;  %v32_v58 = vld [vmem:[%s893_s0 + $0x90] sm:$0xff] }
   0x8   :  { %v217_v33 = vmax.f32 %v153_v20, 0.0  ;;  %v219_v38 = vmax.f32 %v155_v27, 0.0  ;;  %v90_v39 = vmul.f32 %v374_v1, %v22_v23  ;;  %v91_v40 = vmul.f32 %v374_v1, %v23_v24  ;;  %v33_v59 = vld [vmem:[%s893_s0 + $0x98] sm:$0xff]  ;;  %v34_v62 = vld [vmem:[%s893_s0 + $0xa0] sm:$0xff]  ;;  %v35_v5 = vld [vmem:[%s893_s0 + $0xa8] sm:$0xff] }
   0x9   :  { %278 = vst [vmem:[%s896_s3] sm:$0xff] %v214_v25  ;;  %v218_v37 = vmax.f32 %v154_v21, 0.0  ;;  %v220_v42 = vmax.f32 %v156_v28, 0.0  ;;  %v92_v43 = vmul.f32 %v374_v1, %v24_v29  ;;  %v93_v44 = vmul.f32 %v374_v1, %v25_v30  ;;  %v36_v10 = vld [vmem:[%s893_s0 + $0xb0] sm:$0xff]  ;;  %v37_v14 = vld [vmem:[%s893_s0 + $0xb8] sm:$0xff]  ;;  %v38_v18 = vld [vmem:[%s893_s0 + $0xc0] sm:$0xff] }
   0xa   :  { %279 = vst [vmem:[%s896_s3 + $0x8] sm:$0xff] %v215_v26  ;;  %v94_v45 = vmul.f32 %v374_v1, %v26_v31  ;;  %v158_v46 = vadd.f32 %v379_v2, %v90_v39  ;;  %v159_v47 = vadd.f32 %v379_v2, %v91_v40  ;;  %v95_v48 = vmul.f32 %v374_v1, %v27_v35  ;;  %v39_v22 = vld [vmem:[%s893_s0 + $0xc8] sm:$0xff]  ;;  %v40_v26 = vld [vmem:[%s893_s0 + $0xd0] sm:$0xff]  ;;  %v41_v30 = vld [vmem:[%s893_s0 + $0xd8] sm:$0xff] }
   0xb   :  { %280 = vst [vmem:[%s896_s3 + $0x10] sm:$0xff] %v216_v32  ;;  %v96_v49 = vmul.f32 %v374_v1, %v28_v36  ;;  %v221_v50 = vmax.f32 %v157_v34, 0.0  ;;  %v160_v51 = vadd.f32 %v379_v2, %v92_v43  ;;  %v161_v52 = vadd.f32 %v379_v2, %v93_v44  ;;  %v42_v34 = vld [vmem:[%s893_s0 + $0xe0] sm:$0xff] }
   0xc   :  { %281 = vst [vmem:[%s896_s3 + $0x18] sm:$0xff] %v217_v33  ;;  %v97_v53 = vmul.f32 %v374_v1, %v29_v41  ;;  %v222_v56 = vmax.f32 %v158_v46, 0.0  ;;  %v162_v57 = vadd.f32 %v379_v2, %v94_v45  ;;  %v223_v60 = vmax.f32 %v159_v47, 0.0  ;;  %v45_v46 = vld [vmem:[%s893_s0 + $0xf8] sm:$0xff] }
   0xd   :  { %282 = vst [vmem:[%s896_s3 + $0x20] sm:$0xff] %v218_v37  ;;  %v163_v61 = vadd.f32 %v379_v2, %v95_v48  ;;  %v224_v63 = vmax.f32 %v160_v51, 0.0  ;;  %v164_v0 = vadd.f32 %v379_v2, %v96_v49  ;;  %v98_v3 = vmul.f32 %v374_v1, %v30_v54  ;;  %v47_v54 = vld [vmem:[%s893_s0 + $0x108] sm:$0xff] }
   0xe   :  { %283 = vst [vmem:[%s896_s3 + $0x28] sm:$0xff] %v219_v38  ;;  %v99_v4 = vmul.f32 %v374_v1, %v31_v55  ;;  %v225_v6 = vmax.f32 %v161_v52, 0.0  ;;  %v165_v7 = vadd.f32 %v379_v2, %v97_v53  ;;  %v100_v8 = vmul.f32 %v374_v1, %v32_v58  ;;  %v43_v38 = vld [vmem:[%s893_s0 + $0xe8] sm:$0xff]  ;;  %v48_v58 = vld [vmem:[%s893_s0 + $0x110] sm:$0xff] }
   0xf   :  { %284 = vst [vmem:[%s896_s3 + $0x30] sm:$0xff] %v220_v42  ;;  %v101_v9 = vmul.f32 %v374_v1, %v33_v59  ;;  %v226_v11 = vmax.f32 %v162_v57, 0.0  ;;  %v166_v12 = vadd.f32 %v379_v2, %v98_v3  ;;  %v102_v13 = vmul.f32 %v374_v1, %v34_v62  ;;  %v44_v42 = vld [vmem:[%s893_s0 + $0xf0] sm:$0xff]  ;;  %v49_v62 = vld [vmem:[%s893_s0 + $0x118] sm:$0xff] }
  0x10   :  { %285 = vst [vmem:[%s896_s3 + $0x38] sm:$0xff] %v221_v50  ;;  %v227_v15 = vmax.f32 %v163_v61, 0.0  ;;  %v167_v16 = vadd.f32 %v379_v2, %v99_v4  ;;  %v103_v17 = vmul.f32 %v374_v1, %v35_v5  ;;  %v228_v19 = vmax.f32 %v164_v0, 0.0  ;;  %v46_v50 = vld [vmem:[%s893_s0 + $0x100] sm:$0xff] }
  0x11   :  { %286 = vst [vmem:[%s896_s3 + $0x40] sm:$0xff] %v222_v56  ;;  %v168_v20 = vadd.f32 %v379_v2, %v100_v8  ;;  %v104_v21 = vmul.f32 %v374_v1, %v36_v10  ;;  %v229_v23 = vmax.f32 %v165_v7, 0.0  ;;  %v169_v24 = vadd.f32 %v379_v2, %v101_v9  ;;  %v50_v4 = vld [vmem:[%s893_s0 + $0x120] sm:$0xff]  ;;  %v51_v8 = vld [vmem:[%s893_s0 + $0x128] sm:$0xff] }
  0x12   :  { %287 = vst [vmem:[%s896_s3 + $0x48] sm:$0xff] %v223_v60  ;;  %v105_v25 = vmul.f32 %v374_v1, %v37_v14  ;;  %v230_v27 = vmax.f32 %v166_v12, 0.0  ;;  %v170_v28 = vadd.f32 %v379_v2, %v102_v13  ;;  %v106_v29 = vmul.f32 %v374_v1, %v38_v18  ;;  %v52_v12 = vld [vmem:[%s893_s0 + $0x130] sm:$0xff] }
  0x13   :  { %288 = vst [vmem:[%s896_s3 + $0x50] sm:$0xff] %v224_v63  ;;  %v231_v31 = vmax.f32 %v167_v16, 0.0  ;;  %v171_v32 = vadd.f32 %v379_v2, %v103_v17  ;;  %v107_v33 = vmul.f32 %v374_v1, %v39_v22  ;;  %v232_v35 = vmax.f32 %v168_v20, 0.0  ;;  %v53_v16 = vld [vmem:[%s893_s0 + $0x138] sm:$0xff]  ;;  %v54_v20 = vld [vmem:[%s893_s0 + $0x140] sm:$0xff] }
  0x14   :  { %289 = vst [vmem:[%s896_s3 + $0x58] sm:$0xff] %v225_v6  ;;  %v172_v36 = vadd.f32 %v379_v2, %v104_v21  ;;  %v108_v37 = vmul.f32 %v374_v1, %v40_v26  ;;  %v233_v39 = vmax.f32 %v169_v24, 0.0  ;;  %v173_v40 = vadd.f32 %v379_v2, %v105_v25  ;;  %v55_v24 = vld [vmem:[%s893_s0 + $0x148] sm:$0xff] }
  0x15   :  { %290 = vst [vmem:[%s896_s3 + $0x60] sm:$0xff] %v226_v11  ;;  %v109_v41 = vmul.f32 %v374_v1, %v41_v30  ;;  %v234_v43 = vmax.f32 %v170_v28, 0.0  ;;  %v174_v44 = vadd.f32 %v379_v2, %v106_v29  ;;  %v110_v45 = vmul.f32 %v374_v1, %v42_v34  ;;  %v56_v28 = vld [vmem:[%s893_s0 + $0x150] sm:$0xff] }
  0x16   :  { %291 = vst [vmem:[%s896_s3 + $0x68] sm:$0xff] %v227_v15  ;;  %v235_v47 = vmax.f32 %v171_v32, 0.0  ;;  %v175_v48 = vadd.f32 %v379_v2, %v107_v33  ;;  %v111_v49 = vmul.f32 %v374_v1, %v43_v38  ;;  %v236_v51 = vmax.f32 %v172_v36, 0.0  ;;  %v57_v32 = vld [vmem:[%s893_s0 + $0x158] sm:$0xff]  ;;  %v58_v36 = vld [vmem:[%s893_s0 + $0x160] sm:$0xff] }
  0x17   :  { %292 = vst [vmem:[%s896_s3 + $0x70] sm:$0xff] %v228_v19  ;;  %v176_v52 = vadd.f32 %v379_v2, %v108_v37  ;;  %v112_v53 = vmul.f32 %v374_v1, %v44_v42  ;;  %v237_v55 = vmax.f32 %v173_v40, 0.0  ;;  %v177_v56 = vadd.f32 %v379_v2, %v109_v41  ;;  %v59_v40 = vld [vmem:[%s893_s0 + $0x168] sm:$0xff] }
  0x18   :  { %293 = vst [vmem:[%s896_s3 + $0x78] sm:$0xff] %v229_v23  ;;  %v113_v57 = vmul.f32 %v374_v1, %v45_v46  ;;  %v238_v59 = vmax.f32 %v174_v44, 0.0  ;;  %v178_v60 = vadd.f32 %v379_v2, %v110_v45  ;;  %v114_v61 = vmul.f32 %v374_v1, %v46_v50  ;;  %v60_v44 = vld [vmem:[%s893_s0 + $0x170] sm:$0xff] }
  0x19   :  { %294 = vst [vmem:[%s896_s3 + $0x80] sm:$0xff] %v230_v27  ;;  %v239_v63 = vmax.f32 %v175_v48, 0.0  ;;  %v179_v0 = vadd.f32 %v379_v2, %v111_v49  ;;  %v115_v3 = vmul.f32 %v374_v1, %v47_v54  ;;  %v240_v5 = vmax.f32 %v176_v52, 0.0  ;;  %v61_v48 = vld [vmem:[%s893_s0 + $0x178] sm:$0xff]  ;;  %v62_v52 = vld [vmem:[%s893_s0 + $0x180] sm:$0xff] }
  0x1a   :  { %295 = vst [vmem:[%s896_s3 + $0x88] sm:$0xff] %v231_v31  ;;  %v180_v6 = vadd.f32 %v379_v2, %v112_v53  ;;  %v116_v7 = vmul.f32 %v374_v1, %v48_v58  ;;  %v241_v9 = vmax.f32 %v177_v56, 0.0  ;;  %v181_v10 = vadd.f32 %v379_v2, %v113_v57  ;;  %v63_v56 = vld [vmem:[%s893_s0 + $0x188] sm:$0xff] }
  0x1b   :  { %296 = vst [vmem:[%s896_s3 + $0x90] sm:$0xff] %v232_v35  ;;  %v117_v11 = vmul.f32 %v374_v1, %v49_v62  ;;  %v242_v13 = vmax.f32 %v178_v60, 0.0  ;;  %v182_v14 = vadd.f32 %v379_v2, %v114_v61  ;;  %v118_v15 = vmul.f32 %v374_v1, %v50_v4  ;;  %v64_v60 = vld [vmem:[%s893_s0 + $0x190] sm:$0xff] }
  0x1c   :  { %297 = vst [vmem:[%s896_s3 + $0x98] sm:$0xff] %v233_v39  ;;  %v243_v17 = vmax.f32 %v179_v0, 0.0  ;;  %v183_v18 = vadd.f32 %v379_v2, %v115_v3  ;;  %v119_v19 = vmul.f32 %v374_v1, %v51_v8  ;;  %v244_v21 = vmax.f32 %v180_v6, 0.0  ;;  %v65_v0 = vld [vmem:[%s893_s0 + $0x198] sm:$0xff] }
  0x1d   :  { %298 = vst [vmem:[%s896_s3 + $0xa0] sm:$0xff] %v234_v43  ;;  %v184_v22 = vadd.f32 %v379_v2, %v116_v7  ;;  %v120_v23 = vmul.f32 %v374_v1, %v52_v12  ;;  %v245_v25 = vmax.f32 %v181_v10, 0.0  ;;  %v185_v26 = vadd.f32 %v379_v2, %v117_v11  ;;  %v77_v3 = vld [vmem:[%s893_s0 + $0x1f8] sm:$0xff]  ;;  %v66_v7 = vld [vmem:[%s893_s0 + $0x1a0] sm:$0xff]  ;;  %v67_v11 = vld [vmem:[%s893_s0 + $0x1a8] sm:$0xff] }
  0x1e   :  { %299 = vst [vmem:[%s896_s3 + $0xa8] sm:$0xff] %v235_v47  ;;  %v121_v27 = vmul.f32 %v374_v1, %v53_v16  ;;  %v246_v29 = vmax.f32 %v182_v14, 0.0  ;;  %v186_v30 = vadd.f32 %v379_v2, %v118_v15  ;;  %v122_v31 = vmul.f32 %v374_v1, %v54_v20  ;;  %v68_v15 = vld [vmem:[%s893_s0 + $0x1b0] sm:$0xff]  ;;  %v69_v20 = vld [vmem:[%s893_s0 + $0x1b8] sm:$0xff] }
  0x1f   :  { %300 = vst [vmem:[%s896_s3 + $0xb0] sm:$0xff] %v236_v51  ;;  %v247_v33 = vmax.f32 %v183_v18, 0.0  ;;  %v187_v34 = vadd.f32 %v379_v2, %v119_v19  ;;  %v123_v35 = vmul.f32 %v374_v1, %v55_v24  ;;  %v248_v37 = vmax.f32 %v184_v22, 0.0  ;;  %v70_v24 = vld [vmem:[%s893_s0 + $0x1c0] sm:$0xff] }
  0x20   :  { %301 = vst [vmem:[%s896_s3 + $0xb8] sm:$0xff] %v237_v55  ;;  %v188_v38 = vadd.f32 %v379_v2, %v120_v23  ;;  %v124_v39 = vmul.f32 %v374_v1, %v56_v28  ;;  %v249_v41 = vmax.f32 %v185_v26, 0.0  ;;  %v189_v42 = vadd.f32 %v379_v2, %v121_v27 }
  0x21   :  { %302 = vst [vmem:[%s896_s3 + $0xc0] sm:$0xff] %v238_v59  ;;  %v125_v43 = vmul.f32 %v374_v1, %v57_v32  ;;  %v250_v45 = vmax.f32 %v186_v30, 0.0  ;;  %v190_v46 = vadd.f32 %v379_v2, %v122_v31  ;;  %v126_v47 = vmul.f32 %v374_v1, %v58_v36 }
  0x22   :  { %303 = vst [vmem:[%s896_s3 + $0xc8] sm:$0xff] %v239_v63  ;;  %v251_v49 = vmax.f32 %v187_v34, 0.0  ;;  %v191_v50 = vadd.f32 %v379_v2, %v123_v35  ;;  %v127_v51 = vmul.f32 %v374_v1, %v59_v40  ;;  %v252_v53 = vmax.f32 %v188_v38, 0.0 }
  0x23   :  { %304 = vst [vmem:[%s896_s3 + $0xd0] sm:$0xff] %v240_v5  ;;  %v192_v54 = vadd.f32 %v379_v2, %v124_v39  ;;  %v128_v55 = vmul.f32 %v374_v1, %v60_v44  ;;  %v253_v57 = vmax.f32 %v189_v42, 0.0  ;;  %v193_v58 = vadd.f32 %v379_v2, %v125_v43 }
  0x24   :  { %305 = vst [vmem:[%s896_s3 + $0xd8] sm:$0xff] %v241_v9  ;;  %v129_v59 = vmul.f32 %v374_v1, %v61_v48  ;;  %v254_v61 = vmax.f32 %v190_v46, 0.0  ;;  %v194_v62 = vadd.f32 %v379_v2, %v126_v47  ;;  %v130_v63 = vmul.f32 %v374_v1, %v62_v52 }
  0x25   :  { %306 = vst [vmem:[%s896_s3 + $0xe0] sm:$0xff] %v242_v13  ;;  %v255_v4 = vmax.f32 %v191_v50, 0.0  ;;  %v195_v5 = vadd.f32 %v379_v2, %v127_v51  ;;  %v131_v6 = vmul.f32 %v374_v1, %v63_v56  ;;  %v256_v8 = vmax.f32 %v192_v54, 0.0 }
  0x26   :  { %307 = vst [vmem:[%s896_s3 + $0xe8] sm:$0xff] %v243_v17  ;;  %v196_v9 = vadd.f32 %v379_v2, %v128_v55  ;;  %v132_v10 = vmul.f32 %v374_v1, %v64_v60  ;;  %v257_v12 = vmax.f32 %v193_v58, 0.0  ;;  %v197_v13 = vadd.f32 %v379_v2, %v129_v59 }
  0x27   :  { %308 = vst [vmem:[%s896_s3 + $0xf0] sm:$0xff] %v244_v21  ;;  %v133_v14 = vmul.f32 %v374_v1, %v65_v0  ;;  %v145_v16 = vmul.f32 %v374_v1, %v77_v3  ;;  %v258_v17 = vmax.f32 %v194_v62, 0.0  ;;  %v198_v18 = vadd.f32 %v379_v2, %v130_v63 }
  0x28   :  { %309 = vst [vmem:[%s896_s3 + $0xf8] sm:$0xff] %v245_v25  ;;  %v134_v19 = vmul.f32 %v374_v1, %v66_v7  ;;  %v259_v21 = vmax.f32 %v195_v5, 0.0  ;;  %v199_v22 = vadd.f32 %v379_v2, %v131_v6  ;;  %v135_v23 = vmul.f32 %v374_v1, %v67_v11 }
  0x29   :  { %310 = vst [vmem:[%s896_s3 + $0x100] sm:$0xff] %v246_v29  ;;  %v784_v25 = vadd.f32 %v379_v2, %v145_v16  ;;  %v260_v26 = vmax.f32 %v196_v9, 0.0  ;;  %v200_v27 = vadd.f32 %v379_v2, %v132_v10  ;;  %v136_v28 = vmul.f32 %v374_v1, %v68_v15  ;;  %v71_v29 = vld [vmem:[%s893_s0 + $0x1c8] sm:$0xff] }
  0x2a   :  { %311 = vst [vmem:[%s896_s3 + $0x108] sm:$0xff] %v247_v33  ;;  %v261_v30 = vmax.f32 %v197_v13, 0.0  ;;  %v201_v31 = vadd.f32 %v379_v2, %v133_v14  ;;  %v137_v32 = vmul.f32 %v374_v1, %v69_v20  ;;  %v72_v33 = vld [vmem:[%s893_s0 + $0x1d0] sm:$0xff]  ;;  %v262_v34 = vmax.f32 %v198_v18, 0.0 }
  0x2b   :  { %312 = vst [vmem:[%s896_s3 + $0x110] sm:$0xff] %v248_v37  ;;  %v202_v35 = vadd.f32 %v379_v2, %v134_v19  ;;  %v138_v36 = vmul.f32 %v374_v1, %v70_v24  ;;  %v73_v37 = vld [vmem:[%s893_s0 + $0x1d8] sm:$0xff]  ;;  %v263_v38 = vmax.f32 %v199_v22, 0.0  ;;  %v203_v39 = vadd.f32 %v379_v2, %v135_v23 }
  0x2c   :  { %313 = vst [vmem:[%s896_s3 + $0x118] sm:$0xff] %v249_v41  ;;  %v139_v40 = vmul.f32 %v374_v1, %v71_v29  ;;  %v74_v41 = vld [vmem:[%s893_s0 + $0x1e0] sm:$0xff]  ;;  %v264_v42 = vmax.f32 %v200_v27, 0.0  ;;  %v204_v43 = vadd.f32 %v379_v2, %v136_v28  ;;  %v140_v44 = vmul.f32 %v374_v1, %v72_v33 }
  0x2d   :  { %314 = vst [vmem:[%s896_s3 + $0x120] sm:$0xff] %v250_v45  ;;  %v75_v45 = vld [vmem:[%s893_s0 + $0x1e8] sm:$0xff]  ;;  %v265_v46 = vmax.f32 %v201_v31, 0.0  ;;  %v205_v47 = vadd.f32 %v379_v2, %v137_v32  ;;  %v141_v48 = vmul.f32 %v374_v1, %v73_v37  ;;  %v266_v50 = vmax.f32 %v202_v35, 0.0 }
  0x2e   :  { %315 = vst [vmem:[%s896_s3 + $0x128] sm:$0xff] %v251_v49  ;;  %v76_v49 = vld [vmem:[%s893_s0 + $0x1f0] sm:$0xff]  ;;  %v206_v51 = vadd.f32 %v379_v2, %v138_v36  ;;  %v142_v52 = vmul.f32 %v374_v1, %v74_v41  ;;  %v207_v54 = vadd.f32 %v379_v2, %v139_v40  ;;  %v143_v55 = vmul.f32 %v374_v1, %v75_v45 }
  0x2f   :  { %316 = vst [vmem:[%s896_s3 + $0x130] sm:$0xff] %v252_v53  ;;  %v267_v53 = vmax.f32 %v203_v39, 0.0  ;;  %v268_v56 = vmax.f32 %v204_v43, 0.0  ;;  %v144_v58 = vmul.f32 %v374_v1, %v76_v49  ;;  %v269_v59 = vmax.f32 %v205_v47, 0.0 }
  0x30   :  { %317 = vst [vmem:[%s896_s3 + $0x138] sm:$0xff] %v253_v57  ;;  %v208_v57 = vadd.f32 %v379_v2, %v140_v44  ;;  %v209_v60 = vadd.f32 %v379_v2, %v141_v48  ;;  %v210_v62 = vadd.f32 %v379_v2, %v142_v52  ;;  %v271_v63 = vmax.f32 %v207_v54, 0.0 }
  0x31   :  { %318 = vst [vmem:[%s896_s3 + $0x140] sm:$0xff] %v254_v61  ;;  %v270_v61 = vmax.f32 %v206_v51, 0.0  ;;  %v211_v1 = vadd.f32 %v379_v2, %v143_v55  ;;  %v212_v3 = vadd.f32 %v379_v2, %v144_v58  ;;  %v277_v7 = vmax.f32 %v784_v25, 0.0 }
  0x32   :  { %319 = vst [vmem:[%s896_s3 + $0x148] sm:$0xff] %v255_v4  ;;  %v272_v0 = vmax.f32 %v208_v57, 0.0  ;;  %v273_v4 = vmax.f32 %v209_v60, 0.0  ;;  %v274_v5 = vmax.f32 %v210_v62, 0.0 }
  0x33   :  { %320 = vst [vmem:[%s896_s3 + $0x150] sm:$0xff] %v256_v8  ;;  %v275_v6 = vmax.f32 %v211_v1, 0.0  ;;  %v276_v2 = vmax.f32 %v212_v3, 0.0 }
  0x34   :  { %321 = vst [vmem:[%s896_s3 + $0x158] sm:$0xff] %v257_v12 }
  0x35   :  { %322 = vst [vmem:[%s896_s3 + $0x160] sm:$0xff] %v258_v17 }
  0x36   :  { %323 = vst [vmem:[%s896_s3 + $0x168] sm:$0xff] %v259_v21 }
  0x37   :  { %324 = vst [vmem:[%s896_s3 + $0x170] sm:$0xff] %v260_v26 }
  0x38   :  { %325 = vst [vmem:[%s896_s3 + $0x178] sm:$0xff] %v261_v30 }
  0x39   :  { %326 = vst [vmem:[%s896_s3 + $0x180] sm:$0xff] %v262_v34 }
  0x3a   :  { %327 = vst [vmem:[%s896_s3 + $0x188] sm:$0xff] %v263_v38 }
  0x3b   :  { %328 = vst [vmem:[%s896_s3 + $0x190] sm:$0xff] %v264_v42 }
  0x3c   :  { %329 = vst [vmem:[%s896_s3 + $0x198] sm:$0xff] %v265_v46 }
  0x3d   :  { %330 = vst [vmem:[%s896_s3 + $0x1a0] sm:$0xff] %v266_v50 }
  0x3e   :  { %331 = vst [vmem:[%s896_s3 + $0x1a8] sm:$0xff] %v267_v53 }
  0x3f   :  { %332 = vst [vmem:[%s896_s3 + $0x1b0] sm:$0xff] %v268_v56 }
  0x40   :  { %333 = vst [vmem:[%s896_s3 + $0x1b8] sm:$0xff] %v269_v59 }
  0x41   :  { %334 = vst [vmem:[%s896_s3 + $0x1c0] sm:$0xff] %v270_v61 }
  0x42   :  { %335 = vst [vmem:[%s896_s3 + $0x1c8] sm:$0xff] %v271_v63 }
  0x43   :  { %336 = vst [vmem:[%s896_s3 + $0x1d0] sm:$0xff] %v272_v0 }
  0x44   :  { %337 = vst [vmem:[%s896_s3 + $0x1d8] sm:$0xff] %v273_v4 }
  0x45   :  { %338 = vst [vmem:[%s896_s3 + $0x1e0] sm:$0xff] %v274_v5 }
  0x46   :  { %339 = vst [vmem:[%s896_s3 + $0x1e8] sm:$0xff] %v275_v6 }
  0x47   :  { %340 = vst [vmem:[%s896_s3 + $0x1f0] sm:$0xff] %v276_v2 }
  0x48   :  { %341 = vst [vmem:[%s896_s3 + $0x1f8] sm:$0xff] %v277_v7 }

// kernel: _lambda_.2
= control target key start
LH: loop header
LB: loop body
LE: loop exit
PB: predicated region body
PF: predicated region fallthrough
CT: control target
= control target key end

     0   :  { %s2247_s12 = smov 0   ;;  %s2249_s13 = smov 0   ;;  %s2906_s0 = inlined_call_operand.vmem [shape: f32[2,16,16,4], index: 0, kind: input, shape index: {}]   ;;  %s2907_s1 = inlined_call_operand.vmem [shape: f32[9,4,128], index: 1, kind: input, shape index: {}]   ;;  %s2908_s2 = inlined_call_operand.vmem [shape: f32[2,16,16,128], index: 2, kind: output, shape index: {0}]   ;;  %s2909_s3 = inlined_call_operand.vmem [shape: f32[2,2,2,128], index: 3, kind: output, shape index: {1}]  }
   0x1   :  { %s2251_s14 = smov 0   ;;  %s2253_s15 = smov 0  }
   0x2   :  { %s2255_s16 = smov 0  }
   0x3 LB: > { %s29_s17 = sadd.s32 1, %s2216_s14  ;;  %s33_s18 = sadd.s32 1, %s2220_s15  ;;  %s2224_s16 = sphi %s2255_s16, %s14_s16   ;;  %s2220_s15 = sphi %s2253_s15, %s2920_s15   ;;  %s2216_s14 = sphi %s2251_s14, %s2919_s14   ;;  %s2212_s13 = sphi %s2249_s13, %s2918_s13   ;;  %s2208_s12 = sphi %s2247_s12, %s2917_s12  }
   0x4   : > { %p31_p0 = scmp.ge.s32.totalorder %s29_s17, 2  ;;  %p1962_p1 = scmp.ge.s32.totalorder %s2224_s16, 1 }
   0x5   : > { %p176_p2 = scmp.lt.s32.totalorder %s2224_s16, 5 }
   0x6   : > { %s2922_s17 = smov (%p31_p0, %s29_s17), 0  ;;  %s2924_s18 = smov (!%p31_p0, %s33_s18), %s2220_s15 }
   0x7   : > { %p177_p3 = pnand %p1962_p1, %p176_p2  ;;  %p35_p4 = scmp.ge.s32.totalorder %s2924_s18, 2 }
   0x9   : > { %s2926_s18 = smov (%p35_p4, %s2924_s18), 0  ;;  %180 = sbr.rel (%p177_p3) target bundleno = 524 (0x20c), region = 28 }
   0xe   : > { %p223_p5 = scmp.lt.s32.totalorder %s2212_s13, 1  ;;  %s2280_s19 = sshll.u32 %s2208_s12, 3  ;;  %vm262_vm0 = vcmask 31744   ;;  %v2226_v0 = vmov 0.0   ;;  %vm265_vm1 = vcmask 25600  }
   0xf   : > { %p235_p6 = scmp.lt.s32.totalorder %s2280_s19, 15  ;;  %p248_p7 = scmp.lt.s32.totalorder %s2208_s12, 1  ;;  %263 = vst.msk [vmem:[#allocation2] sm:$0xff] %vm262_vm0, %v2226_v0 }
  0x10   : > { %s2928_s13 = smov (!%p223_p5, %s2212_s13), 1  ;;  %264 = vst.msk [vmem:[#allocation2 + $0x8] sm:$0xff] %vm262_vm0, %v2226_v0  ;;  %p294_p8 = scmp.eq.s32.totalorder %s2208_s12, 0 }
  0x11   : > { %s236_s20 = scalar_select %p235_p6, %s2280_s19, 15  ;;  %267 = vst.msk [vmem:[#allocation2 + $0x18] sm:$0xff] %vm262_vm0, %v2226_v0 }
  0x12   : > { %s2139_s21 = sshll.u32 %s2928_s13, 8  ;;  %s1967_s22 = sshll.u32 %s2928_s13, 5  ;;  %268 = vst.msk [vmem:[#allocation2 + $0x20] sm:$0xff] %vm262_vm0, %v2226_v0 }
  0x13   : > { %s2292_s25 = scalar_lea.vmem %s2906_s0, %s2139_s21  ;;  %s1966_s26 = sshll.u32 %s236_s20, 1  ;;  %270 = vst.msk [vmem:[#allocation2 + $0x30] sm:$0xff] %vm262_vm0, %v2226_v0 }
  0x14   : > { %s242_s27 = sadd.s32 %s1967_s22, %s1966_s26  ;;  %271 = vst.msk [vmem:[#allocation2 + $0x38] sm:$0xff] %vm262_vm0, %v2226_v0  ;;  %s1969_s5 = sshll.u32 %s2928_s13, 1  ;;  %v299_v1 = vld [vmem:[%s2292_s25] sm:$0xff] (%p294_p8)  ;;  %v300_v2 = vld [vmem:[%s2292_s25 + $0x8] sm:$0xff] (%p294_p8)  ;;  %v301_v3 = vld [vmem:[%s2292_s25 + $0x10] sm:$0xff] (%p294_p8) }
  0x15   : > { %s1968_s28 = sshll.u32 %s242_s27, 3  ;;  %273 = vst.msk [vmem:[#allocation2 + $0x48] sm:$0xff] %vm262_vm0, %v2226_v0  ;;  %v302_v4 = vld [vmem:[%s2292_s25 + $0x18] sm:$0xff] (%p294_p8)  ;;  %v303_v5 = vld [vmem:[%s2292_s25 + $0x20] sm:$0xff] (%p294_p8)  ;;  %v304_v6 = vld [vmem:[%s2292_s25 + $0x28] sm:$0xff] (%p294_p8) }
  0x16   : > { %s2301_s4 = scalar_lea.vmem %s2908_s2, %s1968_s28  ;;  %274 = vst.msk [vmem:[#allocation2 + $0x50] sm:$0xff] %vm262_vm0, %v2226_v0  ;;  %v305_v7 = vld [vmem:[%s2292_s25 + $0x30] sm:$0xff] (%p294_p8)  ;;  %v306_v8 = vld [vmem:[%s2292_s25 + $0x38] sm:$0xff] (%p294_p8)  ;;  %v307_v9 = vld [vmem:[%s2292_s25 + $0x40] sm:$0xff] (%p294_p8) }
  0x17   : > { %s249_s6 = scalar_select %p248_p7, %s2208_s12, 1  ;;  %276 = vst.msk [vmem:[#allocation2 + $0x60] sm:$0xff] %vm262_vm0, %v2226_v0  ;;  %v308_v10 = vld [vmem:[%s2292_s25 + $0x48] sm:$0xff] (%p294_p8)  ;;  %v309_v11 = vld [vmem:[%s2292_s25 + $0x50] sm:$0xff] (%p294_p8)  ;;  %v310_v12 = vld [vmem:[%s2292_s25 + $0x58] sm:$0xff] (%p294_p8) }
  0x18   : > { %277 = vst.msk [vmem:[#allocation2 + $0x68] sm:$0xff] %vm262_vm0, %v2226_v0  ;;  %v311_v13 = vld [vmem:[%s2292_s25 + $0x60] sm:$0xff] (%p294_p8)  ;;  %v312_v14 = vld [vmem:[%s2292_s25 + $0x68] sm:$0xff] (%p294_p8)  ;;  %v313_v15 = vld [vmem:[%s2292_s25 + $0x70] sm:$0xff] (%p294_p8) }
  0x19   : > { %s254_s7 = sadd.s32 %s1969_s5, %s249_s6  ;;  %279 = vst.msk [vmem:[#allocation2 + $0x78] sm:$0xff] %vm262_vm0, %v2226_v0  ;;  %v314_v16 = vld [vmem:[%s2292_s25 + $0x78] sm:$0xff] (%p294_p8)  ;;  %v315_v17 = vld [vmem:[%s2292_s25 + $0x80] sm:$0xff] (%p294_p8)  ;;  %v316_v18 = vld [vmem:[%s2292_s25 + $0x88] sm:$0xff] (%p294_p8) }
  0x1a   : > { %s1970_s8 = sshll.u32 %s254_s7, 1  ;;  %280 = vst.msk [vmem:[#allocation2 + $0x80] sm:$0xff] %vm262_vm0, %v2226_v0 }
  0x1b   : > { %s2314_s11 = scalar_lea.vmem %s2909_s3, %s1970_s8  ;;  %282 = vst.msk [vmem:[#allocation2 + $0x90] sm:$0xff] %vm262_vm0, %v2226_v0 }
  0x1c   : > { %283 = vst.msk [vmem:[#allocation2 + $0x98] sm:$0xff] %vm262_vm0, %v2226_v0 }
  0x1d   : > { %285 = vst.msk [vmem:[#allocation2 + $0xa8] sm:$0xff] %vm262_vm0, %v2226_v0 }
  0x1e   : > { %286 = vst.msk [vmem:[#allocation2 + $0xb0] sm:$0xff] %vm262_vm0, %v2226_v0 }
  0x1f   : > { %288 = vst.msk [vmem:[#allocation2 + $0xc0] sm:$0xff] %vm262_vm0, %v2226_v0 }
  0x20   : > { %289 = vst.msk [vmem:[#allocation2 + $0xc8] sm:$0xff] %vm262_vm0, %v2226_v0 }
  0x21   : > { %291 = vst.msk [vmem:[#allocation2 + $0xd8] sm:$0xff] %vm262_vm0, %v2226_v0 }
  0x22   : > { %292 = vst.msk [vmem:[#allocation2 + $0xe0] sm:$0xff] %vm262_vm0, %v2226_v0 }
  0x23   : > { %266 = vst.msk [vmem:[#allocation2 + $0x10] sm:$0x3] %vm265_vm1, %v2226_v0 }
  0x24   : > { %269 = vst.msk [vmem:[#allocation2 + $0x28] sm:$0x3] %vm265_vm1, %v2226_v0 }
  0x25   : > { %272 = vst.msk [vmem:[#allocation2 + $0x40] sm:$0x3] %vm265_vm1, %v2226_v0 }
  0x26   : > { %275 = vst.msk [vmem:[#allocation2 + $0x58] sm:$0x3] %vm265_vm1, %v2226_v0 }
  0x27   : > { %278 = vst.msk [vmem:[#allocation2 + $0x70] sm:$0x3] %vm265_vm1, %v2226_v0 }
  0x28   : > { %281 = vst.msk [vmem:[#allocation2 + $0x88] sm:$0x3] %vm265_vm1, %v2226_v0  ;;  %298 = sbr.rel (!%p294_p8) target bundleno = 63 (0x3f), region = 36 }
  0x29   : > { %284 = vst.msk [vmem:[#allocation2 + $0xa0] sm:$0x3] %vm265_vm1, %v2226_v0 }
  0x2a   : > { %287 = vst.msk [vmem:[#allocation2 + $0xb8] sm:$0x3] %vm265_vm1, %v2226_v0 }
  0x2b   : > { %290 = vst.msk [vmem:[#allocation2 + $0xd0] sm:$0x3] %vm265_vm1, %v2226_v0 }
  0x2c   : > { %293 = vst.msk [vmem:[#allocation2 + $0xe8] sm:$0x3] %vm265_vm1, %v2226_v0 }
  0x2d   : > { %319 = vst.msk [vmem:[#allocation2 + $0x19] sm:$0xff] %vm262_vm0, %v299_v1 }
  0x2e   : > { %320 = vst.msk [vmem:[#allocation2 + $0x21] sm:$0xff] %vm262_vm0, %v300_v2 }
  0x2f   : > { %321 = vst.msk [vmem:[#allocation2 + $0x31] sm:$0xff] %vm262_vm0, %v301_v3 }
  0x30   : > { %322 = vst.msk [vmem:[#allocation2 + $0x39] sm:$0xff] %vm262_vm0, %v302_v4 }
  0x31   : > { %323 = vst.msk [vmem:[#allocation2 + $0x49] sm:$0xff] %vm262_vm0, %v303_v5 }
  0x32   : > { %324 = vst.msk [vmem:[#allocation2 + $0x51] sm:$0xff] %vm262_vm0, %v304_v6 }
  0x33   : > { %325 = vst.msk [vmem:[#allocation2 + $0x61] sm:$0xff] %vm262_vm0, %v305_v7 }
  0x34   : > { %326 = vst.msk [vmem:[#allocation2 + $0x69] sm:$0xff] %vm262_vm0, %v306_v8 }
  0x35   : > { %327 = vst.msk [vmem:[#allocation2 + $0x79] sm:$0xff] %vm262_vm0, %v307_v9 }
  0x36   : > { %328 = vst.msk [vmem:[#allocation2 + $0x81] sm:$0xff] %vm262_vm0, %v308_v10 }
  0x37   : > { %329 = vst.msk [vmem:[#allocation2 + $0x91] sm:$0xff] %vm262_vm0, %v309_v11 }
  0x38   : > { %330 = vst.msk [vmem:[#allocation2 + $0x99] sm:$0xff] %vm262_vm0, %v310_v12 }
  0x39   : > { %331 = vst.msk [vmem:[#allocation2 + $0xa9] sm:$0xff] %vm262_vm0, %v311_v13 }
  0x3a   : > { %332 = vst.msk [vmem:[#allocation2 + $0xb1] sm:$0xff] %vm262_vm0, %v312_v14 }
  0x3b   : > { %333 = vst.msk [vmem:[#allocation2 + $0xc1] sm:$0xff] %vm262_vm0, %v313_v15 }
  0x3c   : > { %334 = vst.msk [vmem:[#allocation2 + $0xc9] sm:$0xff] %vm262_vm0, %v314_v16 }
  0x3d   : > { %335 = vst.msk [vmem:[#allocation2 + $0xd9] sm:$0xff] %vm262_vm0, %v315_v17 }
  0x3e   : > { %336 = vst.msk [vmem:[#allocation2 + $0xe1] sm:$0xff] %vm262_vm0, %v316_v18 }
  0x3f PF: > { %p337_p9 = scmp.eq.s32.totalorder %s2208_s12, 1 }
  0x40   : > { %s1974_s13 = sadd.s32 (%p337_p9), 4294967295, %s2280_s19 }
  0x41   : > { %341 = sbr.rel (!%p337_p9) target bundleno = 86 (0x56), region = 40  ;;  %s1975_s20 = sshll.u32 (%p337_p9), %s1974_s13, 4 }
  0x42   : > { %s2365_s21 = scalar_lea.vmem (%p337_p9), %s2292_s25, %s1975_s20 }
  0x43   : > { %v345_v19 = vld [vmem:[%s2365_s21] sm:$0xff] (%p337_p9)  ;;  %v346_v20 = vld [vmem:[%s2365_s21 + $0x8] sm:$0xff] (%p337_p9)  ;;  %v347_v21 = vld [vmem:[%s2365_s21 + $0x10] sm:$0xff] (%p337_p9) }
  0x44   : > { %364 = vst.msk [vmem:[#allocation2 + $0x1] sm:$0xff] (%p337_p9), %vm262_vm0, %v345_v19  ;;  %v348_v22 = vld [vmem:[%s2365_s21 + $0x18] sm:$0xff] (%p337_p9)  ;;  %v349_v23 = vld [vmem:[%s2365_s21 + $0x20] sm:$0xff] (%p337_p9)  ;;  %v350_v24 = vld [vmem:[%s2365_s21 + $0x28] sm:$0xff] (%p337_p9) }
  0x45   : > { %365 = vst.msk [vmem:[#allocation2 + $0x9] sm:$0xff] (%p337_p9), %vm262_vm0, %v346_v20  ;;  %v351_v25 = vld [vmem:[%s2365_s21 + $0x30] sm:$0xff] (%p337_p9)  ;;  %v352_v26 = vld [vmem:[%s2365_s21 + $0x38] sm:$0xff] (%p337_p9)  ;;  %v353_v27 = vld [vmem:[%s2365_s21 + $0x40] sm:$0xff] (%p337_p9) }
  0x46   : > { %366 = vst.msk [vmem:[#allocation2 + $0x19] sm:$0xff] %vm262_vm0, %v347_v21  ;;  %v354_v28 = vld [vmem:[%s2365_s21 + $0x48] sm:$0xff]  ;;  %v355_v29 = vld [vmem:[%s2365_s21 + $0x50] sm:$0xff]  ;;  %v356_v30 = vld [vmem:[%s2365_s21 + $0x58] sm:$0xff] }
  0x47   : > { %367 = vst.msk [vmem:[#allocation2 + $0x21] sm:$0xff] %vm262_vm0, %v348_v22  ;;  %v357_v31 = vld [vmem:[%s2365_s21 + $0x60] sm:$0xff]  ;;  %v358_v32 = vld [vmem:[%s2365_s21 + $0x68] sm:$0xff]  ;;  %v359_v33 = vld [vmem:[%s2365_s21 + $0x70] sm:$0xff] }
  0x48   : > { %368 = vst.msk [vmem:[#allocation2 + $0x31] sm:$0xff] %vm262_vm0, %v349_v23  ;;  %v360_v34 = vld [vmem:[%s2365_s21 + $0x78] sm:$0xff]  ;;  %v361_v35 = vld [vmem:[%s2365_s21 + $0x80] sm:$0xff]  ;;  %v362_v36 = vld [vmem:[%s2365_s21 + $0x88] sm:$0xff] }
  0x49   : > { %369 = vst.msk [vmem:[#allocation2 + $0x39] sm:$0xff] %vm262_vm0, %v350_v24 }
  0x4a   : > { %370 = vst.msk [vmem:[#allocation2 + $0x49] sm:$0xff] %vm262_vm0, %v351_v25 }
  0x4b   : > { %371 = vst.msk [vmem:[#allocation2 + $0x51] sm:$0xff] %vm262_vm0, %v352_v26 }
  0x4c   : > { %372 = vst.msk [vmem:[#allocation2 + $0x61] sm:$0xff] %vm262_vm0, %v353_v27 }
  0x4d   : > { %373 = vst.msk [vmem:[#allocation2 + $0x69] sm:$0xff] %vm262_vm0, %v354_v28 }
  0x4e   : > { %374 = vst.msk [vmem:[#allocation2 + $0x79] sm:$0xff] %vm262_vm0, %v355_v29 }
  0x4f   : > { %375 = vst.msk [vmem:[#allocation2 + $0x81] sm:$0xff] %vm262_vm0, %v356_v30 }
  0x50   : > { %376 = vst.msk [vmem:[#allocation2 + $0x91] sm:$0xff] %vm262_vm0, %v357_v31 }
  0x51   : > { %377 = vst.msk [vmem:[#allocation2 + $0x99] sm:$0xff] %vm262_vm0, %v358_v32 }
  0x52   : > { %378 = vst.msk [vmem:[#allocation2 + $0xa9] sm:$0xff] %vm262_vm0, %v359_v33 }
  0x53   : > { %379 = vst.msk [vmem:[#allocation2 + $0xb1] sm:$0xff] %vm262_vm0, %v360_v34 }
  0x54   : > { %380 = vst.msk [vmem:[#allocation2 + $0xc1] sm:$0xff] %vm262_vm0, %v361_v35 }
  0x55   : > { %381 = vst.msk [vmem:[#allocation2 + $0xc9] sm:$0xff] %vm262_vm0, %v362_v36 }
  0x56 PF: > { %v1976_v37 = vld [vmem:[%s2907_s1 + $0x4] sm:$0xf]  ;;  %vm466_vm2 = vcmask 1043456   ;;  %v2406_v38 = vld [vmem:[#allocation2 + $0x31] sm:$0xff]  ;;  %v2011_v40 = vld [vmem:[%s2907_s1 + $0x8] sm:$0xf] }
  0x57   : > { %v2408_v39 = vld [vmem:[#allocation2 + $0x61] sm:$0xff]  ;;  %2142 = vmatpush.msk.msra.mxu1 %vm466_vm2, %v1976_v37  ;;  %2143 = vmatpush.msk.msra.mxu2 %vm466_vm2, %v1976_v37  ;;  %v2415_v41 = vld [vmem:[#allocation2 + $0x91] sm:$0xff]  ;;  %v2029_v42 = vld [vmem:[%s2907_s1 + $0xc] sm:$0xf]  ;;  %vm1777_vm3 = vcmask 1040384  }
  0x58   : > { %1982 = vmatmul.msk.f32.vlgmr.msra.gmra.mxu1 %vm262_vm0, %v2406_v38  ;;  %1986 = vmatmul.msk.f32.vlgmr.msra.gmra.mxu2 %vm262_vm0, %v2408_v39  ;;  %v398_v43 = vld [vmem:[%s2907_s1] sm:$0xf]  ;;  %v2047_v45 = vld [vmem:[%s2907_s1 + $0x10] sm:$0xf]  ;;  %v2083_v48 = vld [vmem:[%s2907_s1 + $0x18] sm:$0xf] }
  0x59   : > { %2012 = vmatpush.msk.msrb.mxu2 %vm466_vm2, %v2011_v40  ;;  %2144 = vmatpush.msk.msra.mxu3 %vm466_vm2, %v1976_v37  ;;  %v2438_v46 = vld [vmem:[#allocation2 + $0x39] sm:$0xff]  ;;  %v2440_v47 = vld [vmem:[#allocation2 + $0x69] sm:$0xff]  ;;  %v2065_v50 = vld [vmem:[%s2907_s1 + $0x14] sm:$0xf] }
  0x5a   : > { %1990 = vmatmul.msk.f32.vlgmr.msra.gmra.mxu3 %vm262_vm0, %v2415_v41  ;;  %1994 = vmatpush.msk.msrb.mxu1 %vm466_vm2, %v398_v43  ;;  %v2101_v49 = vld [vmem:[%s2907_s1 + $0x1c] sm:$0xf]  ;;  %v2119_v53 = vld [vmem:[%s2907_s1 + $0x20] sm:$0xf]  ;;  %v2468_v54 = vld [vmem:[#allocation2 + $0x49] sm:$0xff] }
  0x5b   : > { %v399_v44 = vld [vmem:[#allocation2 + $0x1] sm:$0xff]  ;;  %2030 = vmatpush.msk.msrb.mxu3 %vm466_vm2, %v2029_v42  ;;  %1977 = vmatpush.msk.msra.mxu0 %vm466_vm2, %v1976_v37  ;;  %v2453_v51 = vld [vmem:[#allocation2 + $0x99] sm:$0xff]  ;;  %v2472_v56 = vld [vmem:[#allocation2 + $0xa9] sm:$0xff] }
  0x5c   : > { %1978 = vmatmul.msk.f32.vlgmr.msra.gmra.mxu0 %vm262_vm0, %v399_v44  ;;  %2084 = vmatpush.msk.msra.mxu2 %vm466_vm2, %v2083_v48  ;;  %v400_v52 = vld [vmem:[#allocation2 + $0x9] sm:$0xff]  ;;  %v2470_v55 = vld [vmem:[#allocation2 + $0x79] sm:$0xff]  ;;  %v2481_v58 = vld [vmem:[#allocation2 + $0x51] sm:$0xff] }
  0x5d   : > { %2048 = vmatpush.msk.msrb.mxu0 %vm466_vm2, %v2047_v45  ;;  %2102 = vmatpush.msk.msra.mxu3 %vm466_vm2, %v2101_v49  ;;  %v401_v57 = vld [vmem:[#allocation2 + $0x19] sm:$0xff]  ;;  %v2483_v59 = vld [vmem:[#allocation2 + $0x81] sm:$0xff]  ;;  %v2485_v60 = vld [vmem:[#allocation2 + $0xb1] sm:$0xff] }
  0x5e   : > { %2066 = vmatpush.msk.msra.mxu1 %vm466_vm2, %v2065_v50  ;;  %v402_v61 = vld [vmem:[#allocation2 + $0x21] sm:$0xff]  ;;  %v802_v0 = vld [vmem:[#allocation2 + $0x18] sm:$0xff]  ;;  %v652_v2 = vld [vmem:[#allocation2 + $0xa] sm:$0xff] }
  0x5f   : > { %2120 = vmatpush.msk.msra.mxu0 %vm466_vm2, %v2119_v53  ;;  %v382_v62 = vld [vmem:[#allocation2] sm:$0xff]  ;;  %v383_v1 = vld [vmem:[#allocation2 + $0x8] sm:$0xff]  ;;  %v2504_v5 = vld [vmem:[#allocation2 + $0x30] sm:$0xff] }
  0x60   : > { %1983 = vmatmul.msk.f32.gmra.mxu1 %vm262_vm0, %v2438_v46  ;;  %1987 = vmatmul.msk.f32.gmra.mxu2 %vm262_vm0, %v2440_v47  ;;  %v651_v63 = vld [vmem:[#allocation2 + $0x2] sm:$0xff]  ;;  %v2502_v4 = vld [vmem:[#allocation2 + $0x1a] sm:$0xff]  ;;  %v2524_v8 = vld [vmem:[#allocation2 + $0x32] sm:$0xff] }
  0x61   : > { %v803_v3 = vld [vmem:[#allocation2 + $0x20] sm:$0xff]  ;;  %v2515_v7 = vld [vmem:[#allocation2 + $0x38] sm:$0xff]  ;;  %v2526_v9 = vld [vmem:[#allocation2 + $0x48] sm:$0xff] }
  0x62   : > { %1991 = vmatmul.msk.f32.gmra.mxu3 %vm262_vm0, %v2453_v51  ;;  %v2513_v6 = vld [vmem:[#allocation2 + $0x22] sm:$0xff]  ;;  %v2536_v10 = vld [vmem:[#allocation2 + $0x3a] sm:$0xff]  ;;  %v2538_v11 = vld [vmem:[#allocation2 + $0x50] sm:$0xff] }
  0x63   : > { %v2548_v12 = vld [vmem:[#allocation2 + $0x4a] sm:$0xff]  ;;  %v2550_v13 = vld [vmem:[#allocation2 + $0x60] sm:$0xff]  ;;  %v2560_v14 = vld [vmem:[#allocation2 + $0x52] sm:$0xff] }
  0x64   : > { %1979 = vmatmul.msk.f32.gmra.mxu0 %vm262_vm0, %v400_v52  ;;  %v2562_v15 = vld [vmem:[#allocation2 + $0x68] sm:$0xff]  ;;  %v2574_v17 = vld [vmem:[#allocation2 + $0x78] sm:$0xff]  ;;  %v2586_v19 = vld [vmem:[#allocation2 + $0x80] sm:$0xff] }
  0x65   : > { %v2572_v16 = vld [vmem:[#allocation2 + $0x62] sm:$0xff]  ;;  %v2584_v18 = vld [vmem:[#allocation2 + $0x6a] sm:$0xff]  ;;  %v2596_v20 = vld [vmem:[#allocation2 + $0x7a] sm:$0xff] }
  0x66   : > { %v2598_v21 = vld [vmem:[#allocation2 + $0x90] sm:$0xff]  ;;  %v2608_v22 = vld [vmem:[#allocation2 + $0x82] sm:$0xff]  ;;  %v2610_v23 = vld [vmem:[#allocation2 + $0x98] sm:$0xff] }
  0x67   : > { %v2622_v25 = vld [vmem:[#allocation2 + $0x92] sm:$0xff]  ;;  %v2624_v26 = vld [vmem:[#allocation2 + $0xa8] sm:$0xff]  ;;  %v2640_v31 = vld [vmem:[#allocation2 + $0x9a] sm:$0xff] }
  0x68   : > { %1984 = vmatmul.msk.f32.gmra.mxu1 %vm262_vm0, %v2468_v54  ;;  %1988 = vmatmul.msk.f32.gmra.mxu2 %vm262_vm0, %v2470_v55  ;;  %v2642_v32 = vld [vmem:[#allocation2 + $0xb0] sm:$0xff]  ;;  %v2660_v40 = vld [vmem:[#allocation2 + $0xc0] sm:$0xff]  ;;  %v2680_v50 = vld [vmem:[#allocation2 + $0xc8] sm:$0xff] }
  0x69   : > { %v2658_v37 = vld [vmem:[#allocation2 + $0xaa] sm:$0xff]  ;;  %v2666_v43 = vld [vmem:[#allocation2 + $0xc1] sm:$0xff]  ;;  %v2678_v49 = vld [vmem:[#allocation2 + $0xb2] sm:$0xff] }
  0x6a   : > { %1992 = vmatmul.msk.f32.gmra.mxu3 %vm262_vm0, %v2472_v56  ;;  %v2686_v53 = vld [vmem:[#allocation2 + $0xc9] sm:$0xff] }
  0x6b   : > { %2912 = vst [vmem:[#allocation4_spill] sm:$0xff] %v2686_v53 }
  0x6c   : > { %1980 = vmatmul.msk.f32.gmra.mxu0 %vm262_vm0, %v401_v57 }
  0x70   : > { %1985 = vmatmul.msk.f32.gmra.mxu1 %vm262_vm0, %v2481_v58  ;;  %1989 = vmatmul.msk.f32.gmra.mxu2 %vm262_vm0, %v2483_v59 }
  0x72   : > { %1993 = vmatmul.msk.f32.gmra.mxu3 %vm262_vm0, %v2485_v60 }
  0x74   : > { %1981 = vmatmul.msk.f32.gmra.mxu0 %vm262_vm0, %v402_v61 }
  0x78   : > { %1995 = vmatmul.msk.f32.vlgmr.msrb.gmra.mxu1 %vm262_vm0, %v382_v62  ;;  %2013 = vmatmul.msk.f32.vlgmr.msrb.gmra.mxu2 %vm262_vm0, %v651_v63 }
  0x7a   : > { %2031 = vmatmul.msk.f32.vlgmr.msrb.gmra.mxu3 %vm262_vm0, %v802_v0 }
  0x7c   : > { %2049 = vmatmul.msk.f32.vlgmr.msrb.gmra.mxu0 %vm262_vm0, %v401_v57 }
  0x80   : > { %1996 = vmatmul.msk.f32.gmra.mxu1 %vm262_vm0, %v383_v1  ;;  %2014 = vmatmul.msk.f32.gmra.mxu2 %vm262_vm0, %v652_v2 }
  0x82   : > { %2032 = vmatmul.msk.f32.gmra.mxu3 %vm262_vm0, %v803_v3 }
  0x84   : > { %2050 = vmatmul.msk.f32.gmra.mxu0 %vm262_vm0, %v402_v61 }
  0x88   : > { %1997 = vmatmul.msk.f32.gmra.mxu1 %vm262_vm0, %v802_v0  ;;  %2015 = vmatmul.msk.f32.gmra.mxu2 %vm262_vm0, %v2502_v4 }
  0x8a   : > { %2033 = vmatmul.msk.f32.gmra.mxu3 %vm262_vm0, %v2504_v5 }
  0x8c   : > { %2051 = vmatmul.msk.f32.gmra.mxu0 %vm262_vm0, %v2406_v38 }
  0x90   : > { %1998 = vmatmul.msk.f32.gmra.mxu1 %vm262_vm0, %v803_v3  ;;  %2016 = vmatmul.msk.f32.gmra.mxu2 %vm262_vm0, %v2513_v6 }
  0x92   : > { %2034 = vmatmul.msk.f32.gmra.mxu3 %vm262_vm0, %v2515_v7 }
  0x94   : > { %2052 = vmatmul.msk.f32.gmra.mxu0 %vm262_vm0, %v2438_v46 }
  0x98   : > { %1999 = vmatmul.msk.f32.gmra.mxu1 %vm262_vm0, %v2504_v5  ;;  %2017 = vmatmul.msk.f32.gmra.mxu2 %vm262_vm0, %v2524_v8 }
  0x9a   : > { %2035 = vmatmul.msk.f32.gmra.mxu3 %vm262_vm0, %v2526_v9 }
  0x9c   : > { %2053 = vmatmul.msk.f32.gmra.mxu0 %vm262_vm0, %v2468_v54 }
  0xa0   : > { %2000 = vmatmul.msk.f32.gmra.mxu1 %vm262_vm0, %v2515_v7  ;;  %2018 = vmatmul.msk.f32.gmra.mxu2 %vm262_vm0, %v2536_v10 }
  0xa2   : > { %2036 = vmatmul.msk.f32.gmra.mxu3 %vm262_vm0, %v2538_v11 }
  0xa4   : > { %2054 = vmatmul.msk.f32.gmra.mxu0 %vm262_vm0, %v2481_v58 }
  0xa8   : > { %2001 = vmatmul.msk.f32.gmra.mxu1 %vm262_vm0, %v2526_v9  ;;  %2019 = vmatmul.msk.f32.gmra.mxu2 %vm262_vm0, %v2548_v12 }
  0xaa   : > { %2037 = vmatmul.msk.f32.gmra.mxu3 %vm262_vm0, %v2550_v13 }
  0xac   : > { %2055 = vmatmul.msk.f32.gmra.mxu0 %vm262_vm0, %v2408_v39 }
  0xb0   : > { %2002 = vmatmul.msk.f32.gmra.mxu1 %vm262_vm0, %v2538_v11  ;;  %2020 = vmatmul.msk.f32.gmra.mxu2 %vm262_vm0, %v2560_v14 }
  0xb2   : > { %2038 = vmatmul.msk.f32.gmra.mxu3 %vm262_vm0, %v2562_v15 }
  0xb4   : > { %2056 = vmatmul.msk.f32.gmra.mxu0 %vm262_vm0, %v2440_v47 }
  0xb8   : > { %2003 = vmatmul.msk.f32.gmra.mxu1 %vm262_vm0, %v2550_v13  ;;  %2021 = vmatmul.msk.f32.gmra.mxu2 %vm262_vm0, %v2572_v16 }
  0xba   : > { %2039 = vmatmul.msk.f32.gmra.mxu3 %vm262_vm0, %v2574_v17 }
  0xbc   : > { %2057 = vmatmul.msk.f32.gmra.mxu0 %vm262_vm0, %v2470_v55 }
  0xc0   : > { %2004 = vmatmul.msk.f32.gmra.mxu1 %vm262_vm0, %v2562_v15  ;;  %2022 = vmatmul.msk.f32.gmra.mxu2 %vm262_vm0, %v2584_v18 }
  0xc2   : > { %2040 = vmatmul.msk.f32.gmra.mxu3 %vm262_vm0, %v2586_v19 }
  0xc4   : > { %2058 = vmatmul.msk.f32.gmra.mxu0 %vm262_vm0, %v2483_v59 }
  0xc8   : > { %2005 = vmatmul.msk.f32.gmra.mxu1 %vm262_vm0, %v2574_v17  ;;  %2023 = vmatmul.msk.f32.gmra.mxu2 %vm262_vm0, %v2596_v20 }
  0xca   : > { %2041 = vmatmul.msk.f32.gmra.mxu3 %vm262_vm0, %v2598_v21 }
  0xcc   : > { %2059 = vmatmul.msk.f32.gmra.mxu0 %vm262_vm0, %v2415_v41 }
  0xd0   : > { %2006 = vmatmul.msk.f32.gmra.mxu1 %vm262_vm0, %v2586_v19  ;;  %2024 = vmatmul.msk.f32.gmra.mxu2 %vm262_vm0, %v2608_v22 }
  0xd2   : > { %2042 = vmatmul.msk.f32.gmra.mxu3 %vm262_vm0, %v2610_v23 }
  0xd4   : > { %2060 = vmatmul.msk.f32.gmra.mxu0 %vm262_vm0, %v2453_v51 }
  0xd5   : > { %v2620_v24 = vpop.f32.mrf.mxu1 }
  0xd8   : > { %2007 = vmatmul.msk.f32.gmra.mxu1 %vm262_vm0, %v2598_v21  ;;  %2025 = vmatmul.msk.f32.gmra.mxu2 %vm262_vm0, %v2622_v25 }
  0xd9   : > { %v487_v27 = vpop.f32.mrf.mxu0 }
  0xda   : > { %2043 = vmatmul.msk.f32.gmra.mxu3 %vm262_vm0, %v2624_v26 }
  0xdb   : > { %v2632_v28 = vpop.f32.mrf.mxu2 }
  0xdc   : > { %2061 = vmatmul.msk.f32.gmra.mxu0 %vm262_vm0, %v2472_v56 }
  0xdd   : > { %v2636_v29 = vpop.f32.mrf.mxu1  ;;  %v2638_v30 = vpop.f32.mrf.mxu3 }
  0xe0   : > { %2008 = vmatmul.msk.f32.gmra.mxu1 %vm262_vm0, %v2610_v23  ;;  %2026 = vmatmul.msk.f32.gmra.mxu2 %vm262_vm0, %v2640_v31 }
  0xe1   : > { %v490_v33 = vpop.f32.mrf.mxu0 }
  0xe2   : > { %2044 = vmatmul.msk.f32.gmra.mxu3 %vm262_vm0, %v2642_v32 }
  0xe3   : > { %v2650_v34 = vpop.f32.mrf.mxu2 }
  0xe4   : > { %2062 = vmatmul.msk.f32.gmra.mxu0 %vm262_vm0, %v2485_v60 }
  0xe5   : > { %v2654_v35 = vpop.f32.mrf.mxu1  ;;  %v2656_v36 = vpop.f32.mrf.mxu3 }
  0xe8   : > { %2009 = vmatmul.msk.f32.gmra.mxu1 %vm262_vm0, %v2624_v26  ;;  %2027 = vmatmul.msk.f32.gmra.mxu2 %vm262_vm0, %v2658_v37 }
  0xe9   : > { %v493_v42 = vpop.f32.mrf.mxu0 }
  0xea   : > { %2045 = vmatmul.msk.f32.gmra.mxu3 %vm262_vm0, %v2660_v40 }
  0xeb   : > { %v2670_v44 = vpop.f32.mrf.mxu2 }
  0xec   : > { %2063 = vmatmul.msk.f32.gmra.mxu0 %vm262_vm0, %v2666_v43 }
  0xed   : > { %v2674_v45 = vpop.f32.mrf.mxu1  ;;  %v2676_v48 = vpop.f32.mrf.mxu3 }
  0xee   : > { %2911 = vst [vmem:[#allocation3_spill] sm:$0xff] %v2676_v48 }
  0xf0   : > { %2010 = vmatmul.msk.f32.gmra.mxu1 %vm262_vm0, %v2642_v32  ;;  %2028 = vmatmul.msk.f32.gmra.mxu2 %vm262_vm0, %v2678_v49 }
  0xf1   : > { %v496_v52 = vpop.f32.mrf.mxu0 }
  0xf2   : > { %2046 = vmatmul.msk.f32.gmra.mxu3 %vm262_vm0, %v2680_v50 }
  0xf3   : > { %v2690_v57 = vpop.f32.mrf.mxu2 }
  0xf4   : > { %2064 = vmatmul.msk.f32.gmra.mxu0 %vm262_vm0, %v2686_v53 }
  0xf5   : > { %v2694_v61 = vpop.f32.mrf.mxu3  ;;  %v603_v62 = vpop.f32.mrf.mxu1 }
  0xf6   : > { %2913 = vst [vmem:[#allocation5_spill] sm:$0xff] %v2694_v61  ;;  %v604_v0 = vadd.f32 %v603_v62, %v487_v27 }
  0xf8   : > { %2067 = vmatmul.msk.f32.vlgmr.msra.gmra.mxu1 %vm262_vm0, %v2502_v4  ;;  %2085 = vmatmul.msk.f32.vlgmr.msra.gmra.mxu2 %vm262_vm0, %v2504_v5 }
  0xf9   : > { %v1038_v63 = vpop.f32.mrf.mxu0 }
  0xfa   : > { %2103 = vmatmul.msk.f32.vlgmr.msra.gmra.mxu3 %vm262_vm0, %v2406_v38 }
  0xfb   : > { %v737_v1 = vpop.f32.mrf.mxu2 }
  0xfc   : > { %v785_v2 = vadd.f32 %v737_v1, %v604_v0  ;;  %2121 = vmatmul.msk.f32.vlgmr.msra.gmra.mxu0 %vm262_vm0, %v2524_v8 }
  0xfd   : > { %v606_v3 = vpop.f32.mrf.mxu1  ;;  %v888_v48 = vpop.f32.mrf.mxu3 }
  0xfe   : > { %v936_v61 = vadd.f32 %v888_v48, %v785_v2  ;;  %v607_v5 = vadd.f32 %v606_v3, %v490_v33 }
 0x100   : > { %v2704_v53 = vadd.f32 %v1038_v63, %v936_v61  ;;  %2068 = vmatmul.msk.f32.gmra.mxu1 %vm262_vm0, %v2513_v6  ;;  %2086 = vmatmul.msk.f32.gmra.mxu2 %vm262_vm0, %v2515_v7 }
 0x101   : > { %v1041_v4 = vpop.f32.mrf.mxu0 }
 0x102   : > { %2104 = vmatmul.msk.f32.gmra.mxu3 %vm262_vm0, %v2438_v46 }
 0x103   : > { %v740_v38 = vpop.f32.mrf.mxu2 }
 0x104   : > { %v786_v27 = vadd.f32 %v740_v38, %v607_v5  ;;  %2122 = vmatmul.msk.f32.gmra.mxu0 %vm262_vm0, %v2536_v10 }
 0x105   : > { %v609_v62 = vpop.f32.mrf.mxu1  ;;  %v891_v48 = vpop.f32.mrf.mxu3 }
 0x106   : > { %v937_v61 = vadd.f32 %v891_v48, %v786_v27  ;;  %v610_v7 = vadd.f32 %v609_v62, %v493_v42 }
 0x108   : > { %v2714_v63 = vadd.f32 %v1041_v4, %v937_v61  ;;  %2069 = vmatmul.msk.f32.gmra.mxu1 %vm262_vm0, %v2524_v8  ;;  %2087 = vmatmul.msk.f32.gmra.mxu2 %vm262_vm0, %v2526_v9 }
 0x109   : > { %v1044_v6 = vpop.f32.mrf.mxu0 }
 0x10a   : > { %2105 = vmatmul.msk.f32.gmra.mxu3 %vm262_vm0, %v2468_v54 }
 0x10b   : > { %v743_v46 = vpop.f32.mrf.mxu2 }
 0x10c   : > { %v787_v33 = vadd.f32 %v743_v46, %v610_v7  ;;  %2123 = vmatmul.msk.f32.gmra.mxu0 %vm262_vm0, %v2548_v12 }
 0x10d   : > { %v612_v0 = vpop.f32.mrf.mxu1  ;;  %v894_v1 = vpop.f32.mrf.mxu3 }
 0x10e   : > { %v938_v2 = vadd.f32 %v894_v1, %v787_v33  ;;  %v613_v9 = vadd.f32 %v612_v0, %v496_v52 }
 0x110   : > { %v2724_v3 = vadd.f32 %v1044_v6, %v938_v2  ;;  %2070 = vmatmul.msk.f32.gmra.mxu1 %vm262_vm0, %v2536_v10  ;;  %2088 = vmatmul.msk.f32.gmra.mxu2 %vm262_vm0, %v2538_v11 }
 0x111   : > { %v1047_v8 = vpop.f32.mrf.mxu0 }
 0x112   : > { %2106 = vmatmul.msk.f32.gmra.mxu3 %vm262_vm0, %v2481_v58 }
 0x113   : > { %v746_v54 = vpop.f32.mrf.mxu2 }
 0x114   : > { %v788_v42 = vadd.f32 %v746_v54, %v613_v9  ;;  %2124 = vmatmul.msk.f32.gmra.mxu0 %vm262_vm0, %v2560_v14 }
 0x115   : > { %v615_v4 = vpop.f32.mrf.mxu1  ;;  %v897_v5 = vpop.f32.mrf.mxu3 }
 0x116   : > { %v939_v38 = vadd.f32 %v897_v5, %v788_v42  ;;  %v616_v11 = vadd.f32 %v615_v4, %v2620_v24 }
 0x118   : > { %v2734_v27 = vadd.f32 %v1047_v8, %v939_v38  ;;  %2071 = vmatmul.msk.f32.gmra.mxu1 %vm262_vm0, %v2548_v12  ;;  %2089 = vmatmul.msk.f32.gmra.mxu2 %vm262_vm0, %v2550_v13 }
 0x119   : > { %v1050_v10 = vpop.f32.mrf.mxu0 }
 0x11a   : > { %2107 = vmatmul.msk.f32.gmra.mxu3 %vm262_vm0, %v2408_v39 }
 0x11b   : > { %v749_v58 = vpop.f32.mrf.mxu2 }
 0x11c   : > { %v789_v52 = vadd.f32 %v749_v58, %v616_v11  ;;  %2125 = vmatmul.msk.f32.gmra.mxu0 %vm262_vm0, %v2572_v16 }
 0x11d   : > { %v618_v62 = vpop.f32.mrf.mxu1  ;;  %v900_v48 = vpop.f32.mrf.mxu3 }
 0x11e   : > { %v940_v61 = vadd.f32 %v900_v48, %v789_v52  ;;  %v619_v13 = vadd.f32 %v618_v62, %v2636_v29 }
 0x120   : > { %v2745_v6 = vadd.f32 %v1050_v10, %v940_v61  ;;  %2072 = vmatmul.msk.f32.gmra.mxu1 %vm262_vm0, %v2560_v14  ;;  %2090 = vmatmul.msk.f32.gmra.mxu2 %vm262_vm0, %v2562_v15 }
 0x121   : > { %v1053_v12 = vpop.f32.mrf.mxu0 }
 0x122   : > { %2108 = vmatmul.msk.f32.gmra.mxu3 %vm262_vm0, %v2440_v47 }
 0x123   : > { %v752_v39 = vpop.f32.mrf.mxu2 }
 0x124   : > { %v790_v24 = vadd.f32 %v752_v39, %v619_v13  ;;  %2126 = vmatmul.msk.f32.gmra.mxu0 %vm262_vm0, %v2584_v18 }
 0x125   : > { %v621_v7 = vpop.f32.mrf.mxu1  ;;  %v903_v46 = vpop.f32.mrf.mxu3 }
 0x126   : > { %v941_v33 = vadd.f32 %v903_v46, %v790_v24  ;;  %v622_v15 = vadd.f32 %v621_v7, %v2654_v35 }
 0x128   : > { %v2756_v0 = vadd.f32 %v1053_v12, %v941_v33  ;;  %2073 = vmatmul.msk.f32.gmra.mxu1 %vm262_vm0, %v2572_v16  ;;  %2091 = vmatmul.msk.f32.gmra.mxu2 %vm262_vm0, %v2574_v17 }
 0x129   : > { %v1056_v14 = vpop.f32.mrf.mxu0 }
 0x12a   : > { %2109 = vmatmul.msk.f32.gmra.mxu3 %vm262_vm0, %v2470_v55 }
 0x12b   : > { %v755_v47 = vpop.f32.mrf.mxu2 }
 0x12c   : > { %v791_v29 = vadd.f32 %v755_v47, %v622_v15  ;;  %2127 = vmatmul.msk.f32.gmra.mxu0 %vm262_vm0, %v2596_v20 }
 0x12d   : > { %v624_v1 = vpop.f32.mrf.mxu1  ;;  %v906_v2 = vpop.f32.mrf.mxu3 }
 0x12e   : > { %v942_v8 = vadd.f32 %v906_v2, %v791_v29  ;;  %v625_v17 = vadd.f32 %v624_v1, %v2674_v45 }
 0x130   : > { %v2767_v9 = vadd.f32 %v1056_v14, %v942_v8  ;;  %2074 = vmatmul.msk.f32.gmra.mxu1 %vm262_vm0, %v2584_v18  ;;  %2092 = vmatmul.msk.f32.gmra.mxu2 %vm262_vm0, %v2586_v19 }
 0x131   : > { %v1059_v16 = vpop.f32.mrf.mxu0 }
 0x132   : > { %2110 = vmatmul.msk.f32.gmra.mxu3 %vm262_vm0, %v2483_v59 }
 0x133   : > { %v758_v55 = vpop.f32.mrf.mxu2 }
 0x134   : > { %v792_v35 = vadd.f32 %v758_v55, %v625_v17  ;;  %2128 = vmatmul.msk.f32.gmra.mxu0 %vm262_vm0, %v2608_v22 }
 0x135   : > { %v627_v54 = vpop.f32.mrf.mxu1  ;;  %v909_v42 = vpop.f32.mrf.mxu3 }
 0x136   : > { %v943_v4 = vadd.f32 %v909_v42, %v792_v35  ;;  %v628_v19 = vadd.f32 %v627_v54, %v2632_v28  ;;  %v1267_v35 = vld [vmem:[#allocation2 + $0xd8] sm:$0xff] }
 0x137   : > { %v1417_v42 = vld [vmem:[#allocation2 + $0xd9] sm:$0xff] }
 0x138   : > { %v2778_v5 = vadd.f32 %v1059_v16, %v943_v4  ;;  %2075 = vmatmul.msk.f32.gmra.mxu1 %vm262_vm0, %v2596_v20  ;;  %2093 = vmatmul.msk.f32.gmra.mxu2 %vm262_vm0, %v2598_v21  ;;  %v2915_v4 = vld [vmem:[#allocation3_spill] sm:$0xff] }
 0x139   : > { %v1062_v18 = vpop.f32.mrf.mxu0 }
 0x13a   : > { %2111 = vmatmul.msk.f32.gmra.mxu3 %vm262_vm0, %v2415_v41 }
 0x13b   : > { %v761_v59 = vpop.f32.mrf.mxu2 }
 0x13c   : > { %v793_v45 = vadd.f32 %v761_v59, %v628_v19  ;;  %2129 = vmatmul.msk.f32.gmra.mxu0 %vm262_vm0, %v2622_v25 }
 0x13d   : > { %v630_v38 = vpop.f32.mrf.mxu1  ;;  %v912_v10 = vpop.f32.mrf.mxu3 }
 0x13e   : > { %v944_v11 = vadd.f32 %v912_v10, %v793_v45  ;;  %v631_v21 = vadd.f32 %v630_v38, %v2650_v34  ;;  %v1268_v10 = vld [vmem:[#allocation2 + $0xe0] sm:$0xff] }
 0x140   : > { %v2789_v58 = vadd.f32 %v1062_v18, %v944_v11  ;;  %2076 = vmatmul.msk.f32.gmra.mxu1 %vm262_vm0, %v2608_v22  ;;  %2094 = vmatmul.msk.f32.gmra.mxu2 %vm262_vm0, %v2610_v23 }
 0x141   : > { %v1065_v20 = vpop.f32.mrf.mxu0 }
 0x142   : > { %2112 = vmatmul.msk.f32.gmra.mxu3 %vm262_vm0, %v2453_v51 }
 0x143   : > { %v764_v41 = vpop.f32.mrf.mxu2 }
 0x144   : > { %v794_v28 = vadd.f32 %v764_v41, %v631_v21  ;;  %2130 = vmatmul.msk.f32.gmra.mxu0 %vm262_vm0, %v2640_v31 }
 0x145   : > { %v633_v52 = vpop.f32.mrf.mxu1  ;;  %v915_v62 = vpop.f32.mrf.mxu3 }
 0x146   : > { %v945_v48 = vadd.f32 %v915_v62, %v794_v28  ;;  %v634_v23 = vadd.f32 %v633_v52, %v2670_v44  ;;  %v1568_v28 = vld [vmem:[#allocation2 + $0xe2] sm:$0xff] }
 0x147   : > { %v2916_v52 = vld [vmem:[#allocation5_spill] sm:$0xff] }
 0x148   : > { %v2800_v61 = vadd.f32 %v1065_v20, %v945_v48  ;;  %2077 = vmatmul.msk.f32.gmra.mxu1 %vm262_vm0, %v2622_v25  ;;  %2095 = vmatmul.msk.f32.gmra.mxu2 %vm262_vm0, %v2624_v26  ;;  %v1418_v20 = vld [vmem:[#allocation2 + $0xe1] sm:$0xff] }
 0x149   : > { %v1068_v22 = vpop.f32.mrf.mxu0 }
 0x14a   : > { %2113 = vmatmul.msk.f32.gmra.mxu3 %vm262_vm0, %v2472_v56 }
 0x14b   : > { %v767_v51 = vpop.f32.mrf.mxu2 }
 0x14c   : > { %v795_v34 = vadd.f32 %v767_v51, %v634_v23  ;;  %2131 = vmatmul.msk.f32.gmra.mxu0 %vm262_vm0, %v2658_v37 }
 0x14d   : > { %v636_v12 = vpop.f32.mrf.mxu1  ;;  %v918_v13 = vpop.f32.mrf.mxu3 }
 0x14e   : > { %v946_v39 = vadd.f32 %v918_v13, %v795_v34  ;;  %v637_v26 = vadd.f32 %v636_v12, %v2690_v57 }
 0x150   : > { %v2811_v24 = vadd.f32 %v1068_v22, %v946_v39  ;;  %2078 = vmatmul.msk.f32.gmra.mxu1 %vm262_vm0, %v2640_v31  ;;  %2096 = vmatmul.msk.f32.gmra.mxu2 %vm262_vm0, %v2642_v32  ;;  %v1565_v32 = vld [vmem:[#allocation2 + $0xc2] sm:$0xff] }
 0x151   : > { %v1071_v25 = vpop.f32.mrf.mxu0 }
 0x152   : > { %2114 = vmatmul.msk.f32.gmra.mxu3 %vm262_vm0, %v2485_v60 }
 0x153   : > { %v770_v56 = vpop.f32.mrf.mxu2 }
 0x154   : > { %v796_v44 = vadd.f32 %v770_v56, %v637_v26  ;;  %2132 = vmatmul.msk.f32.gmra.mxu0 %vm262_vm0, %v2678_v49 }
 0x155   : > { %v639_v7 = vpop.f32.mrf.mxu1  ;;  %v921_v46 = vpop.f32.mrf.mxu3 }
 0x156   : > { %v947_v33 = vadd.f32 %v921_v46, %v796_v44  ;;  %v640_v60 = vadd.f32 %v639_v7, %v2638_v30  ;;  %v1566_v30 = vld [vmem:[#allocation2 + $0xca] sm:$0xff] }
 0x158   : > { %v2822_v14 = vadd.f32 %v1071_v25, %v947_v33  ;;  %2079 = vmatmul.msk.f32.gmra.mxu1 %vm262_vm0, %v2658_v37  ;;  %2097 = vmatmul.msk.f32.gmra.mxu2 %vm262_vm0, %v2660_v40 }
 0x159   : > { %v1074_v31 = vpop.f32.mrf.mxu0 }
 0x15a   : > { %2115 = vmatmul.msk.f32.gmra.mxu3 %vm262_vm0, %v2666_v43  ;;  %v2914_v43 = vld [vmem:[#allocation4_spill] sm:$0xff] }
 0x15b   : > { %v773_v57 = vpop.f32.mrf.mxu2 }
 0x15c   : > { %v797_v15 = vadd.f32 %v773_v57, %v640_v60  ;;  %2133 = vmatmul.msk.f32.gmra.mxu0 %vm262_vm0, %v1565_v32 }
 0x15d   : > { %v642_v47 = vpop.f32.mrf.mxu1  ;;  %v924_v29 = vpop.f32.mrf.mxu3 }
 0x15e   : > { %v948_v1 = vadd.f32 %v924_v29, %v797_v15  ;;  %v643_v40 = vadd.f32 %v642_v47, %v2656_v36  ;;  %v1567_v36 = vld [vmem:[#allocation2 + $0xda] sm:$0xff] }
 0x160   : > { %v2832_v2 = vadd.f32 %v1074_v31, %v948_v1  ;;  %2080 = vmatmul.msk.f32.gmra.mxu1 %vm262_vm0, %v2678_v49  ;;  %2098 = vmatmul.msk.f32.gmra.mxu2 %vm262_vm0, %v2680_v50 }
 0x161   : > { %v1077_v37 = vpop.f32.mrf.mxu0 }
 0x162   : > { %2116 = vmatmul.msk.f32.gmra.mxu3 %vm262_vm0, %v2914_v43 }
 0x163   : > { %v776_v8 = vpop.f32.mrf.mxu2 }
 0x164   : > { %v798_v16 = vadd.f32 %v776_v8, %v643_v40  ;;  %2134 = vmatmul.msk.f32.gmra.mxu0 %vm262_vm0, %v1566_v30 }
 0x165   : > { %v645_v17 = vpop.f32.mrf.mxu1  ;;  %v927_v55 = vpop.f32.mrf.mxu3 }
 0x166   : > { %v949_v54 = vadd.f32 %v927_v55, %v798_v16  ;;  %v646_v18 = vadd.f32 %v645_v17, %v2915_v4 }
 0x168   : > { %v2842_v49 = vadd.f32 %v1077_v37, %v949_v54  ;;  %2081 = vmatmul.msk.f32.gmra.mxu1 %vm262_vm0, %v1565_v32  ;;  %2099 = vmatmul.msk.f32.gmra.mxu2 %vm262_vm0, %v1267_v35 }
 0x169   : > { %v1080_v50 = vpop.f32.mrf.mxu0 }
 0x16a   : > { %2117 = vmatmul.msk.f32.gmra.mxu3 %vm262_vm0, %v1417_v42 }
 0x16b   : > { %v779_v19 = vpop.f32.mrf.mxu2 }
 0x16c   : > { %v799_v59 = vadd.f32 %v779_v19, %v646_v18  ;;  %2135 = vmatmul.msk.f32.gmra.mxu0 %vm262_vm0, %v1567_v36 }
 0x16d   : > { %v648_v45 = vpop.f32.mrf.mxu1  ;;  %v930_v38 = vpop.f32.mrf.mxu3 }
 0x16e   : > { %v950_v11 = vadd.f32 %v930_v38, %v799_v59  ;;  %v649_v62 = vadd.f32 %v648_v45, %v2916_v52 }
 0x170   : > { %v2849_v21 = vadd.f32 %v1080_v50, %v950_v11  ;;  %2082 = vmatmul.msk.f32.gmra.mxu1 %vm262_vm0, %v1566_v30  ;;  %2100 = vmatmul.msk.f32.gmra.mxu2 %vm262_vm0, %v1268_v10 }
 0x171   : > { %v1083_v41 = vpop.f32.mrf.mxu0 }
 0x172   : > { %2118 = vmatmul.msk.f32.gmra.mxu3 %vm262_vm0, %v1418_v20 }
 0x173   : > { %v782_v48 = vpop.f32.mrf.mxu2 }
 0x174   : > { %v800_v22 = vadd.f32 %v782_v48, %v649_v62  ;;  %2136 = vmatmul.msk.f32.gmra.mxu0 %vm262_vm0, %v1568_v28 }
 0x175   : > { %v933_v23 = vpop.f32.mrf.mxu3  ;;  %v1188_v51 = vpop.f32.mrf.mxu1 }
 0x176   : > { %v951_v34 = vadd.f32 %v933_v23, %v800_v22  ;;  %v1236_v39 = vadd.f32 %v1188_v51, %v2704_v53 }
 0x178   : > { %v2856_v12 = vadd.f32 %v1083_v41, %v951_v34 }
 0x179   : > { %v1639_v13 = vpop.f32.mrf.mxu0 }
 0x17b   : > { %v1339_v25 = vpop.f32.mrf.mxu2 }
 0x17c   : > { %v1387_v26 = vadd.f32 %v1339_v25, %v1236_v39 }
 0x17d   : > { %v1191_v56 = vpop.f32.mrf.mxu1  ;;  %v1489_v44 = vpop.f32.mrf.mxu3 }
 0x17e   : > { %v1537_v7 = vadd.f32 %v1489_v44, %v1387_v26  ;;  %v1237_v31 = vadd.f32 %v1191_v56, %v2714_v63 }
 0x180   : > { %v1687_v46 = vadd.f32 %v1639_v13, %v1537_v7 }
 0x181   : > { %v1642_v33 = vpop.f32.mrf.mxu0 }
 0x182   : > { %1703 = vst [vmem:[%s2301_s4] sm:$0xff] %v1687_v46  ;;  %v1740_v53 = vmul.f32 %v1687_v46, %v1687_v46 }
 0x183   : > { %v1342_v32 = vpop.f32.mrf.mxu2 }
 0x184   : > { %v1388_v60 = vadd.f32 %v1342_v32, %v1237_v31 }
 0x185   : > { %v1194_v57 = vpop.f32.mrf.mxu1  ;;  %v1492_v15 = vpop.f32.mrf.mxu3 }
 0x186   : > { %v1538_v47 = vadd.f32 %v1492_v15, %v1388_v60  ;;  %v1238_v37 = vadd.f32 %v1194_v57, %v2724_v3 }
 0x188   : > { %v1688_v29 = vadd.f32 %v1642_v33, %v1538_v47 }
 0x189   : > { %v1645_v1 = vpop.f32.mrf.mxu0 }
 0x18a   : > { %1704 = vst [vmem:[%s2301_s4 + $0x8] sm:$0xff] %v1688_v29  ;;  %v1719_v30 = vadd.f32 %v1688_v29, %v1687_v46  ;;  %v1741_v40 = vmul.f32 %v1688_v29, %v1688_v29 }
 0x18b   : > { %v1345_v43 = vpop.f32.mrf.mxu2 }
 0x18c   : > { %v1756_v8 = vadd.f32 %v1741_v40, %v1740_v53  ;;  %v1389_v16 = vadd.f32 %v1345_v43, %v1238_v37 }
 0x18d   : > { %v1197_v17 = vpop.f32.mrf.mxu1  ;;  %v1495_v63 = vpop.f32.mrf.mxu3 }
 0x18e   : > { %v1539_v55 = vadd.f32 %v1495_v63, %v1389_v16  ;;  %v1239_v42 = vadd.f32 %v1197_v17, %v2734_v27 }
 0x190   : > { %v1689_v35 = vadd.f32 %v1645_v1, %v1539_v55 }
 0x191   : > { %v1648_v54 = vpop.f32.mrf.mxu0 }
 0x192   : > { %1705 = vst [vmem:[%s2301_s4 + $0x10] sm:$0xff] %v1689_v35  ;;  %v1720_v50 = vadd.f32 %v1719_v30, %v1689_v35  ;;  %v1742_v36 = vmul.f32 %v1689_v35, %v1689_v35 }
 0x193   : > { %v1348_v4 = vpop.f32.mrf.mxu2 }
 0x194   : > { %v1757_v18 = vadd.f32 %v1756_v8, %v1742_v36  ;;  %v1390_v3 = vadd.f32 %v1348_v4, %v1239_v42 }
 0x195   : > { %v1200_v19 = vpop.f32.mrf.mxu1  ;;  %v1498_v59 = vpop.f32.mrf.mxu3 }
 0x196   : > { %v1540_v45 = vadd.f32 %v1498_v59, %v1390_v3  ;;  %v1240_v11 = vadd.f32 %v1200_v19, %v2745_v6 }
 0x198   : > { %v1690_v38 = vadd.f32 %v1648_v54, %v1540_v45 }
 0x199   : > { %v1651_v10 = vpop.f32.mrf.mxu0 }
 0x19a   : > { %1706 = vst [vmem:[%s2301_s4 + $0x18] sm:$0xff] %v1690_v38  ;;  %v1721_v20 = vadd.f32 %v1720_v50, %v1690_v38  ;;  %v1743_v41 = vmul.f32 %v1690_v38, %v1690_v38 }
 0x19b   : > { %v1351_v28 = vpop.f32.mrf.mxu2 }
 0x19c   : > { %v1758_v52 = vadd.f32 %v1757_v18, %v1743_v41  ;;  %v1391_v27 = vadd.f32 %v1351_v28, %v1240_v11 }
 0x19d   : > { %v1203_v62 = vpop.f32.mrf.mxu1  ;;  %v1501_v48 = vpop.f32.mrf.mxu3 }
 0x19e   : > { %v1541_v22 = vadd.f32 %v1501_v48, %v1391_v27  ;;  %v1241_v34 = vadd.f32 %v1203_v62, %v2756_v0 }
 0x1a0   : > { %v1691_v23 = vadd.f32 %v1651_v10, %v1541_v22 }
 0x1a1   : > { %v1654_v51 = vpop.f32.mrf.mxu0 }
 0x1a2   : > { %1707 = vst [vmem:[%s2301_s4 + $0x20] sm:$0xff] %v1691_v23  ;;  %v1722_v13 = vadd.f32 %v1721_v20, %v1691_v23  ;;  %v1744_v39 = vmul.f32 %v1691_v23, %v1691_v23 }
 0x1a3   : > { %v1354_v25 = vpop.f32.mrf.mxu2 }
 0x1a4   : > { %v1759_v26 = vadd.f32 %v1758_v52, %v1744_v39  ;;  %v1392_v6 = vadd.f32 %v1354_v25, %v1241_v34 }
 0x1a5   : > { %v1206_v56 = vpop.f32.mrf.mxu1  ;;  %v1504_v44 = vpop.f32.mrf.mxu3 }
 0x1a6   : > { %v1542_v7 = vadd.f32 %v1504_v44, %v1392_v6  ;;  %v1242_v31 = vadd.f32 %v1206_v56, %v2767_v9 }
 0x1a8   : > { %v1692_v46 = vadd.f32 %v1654_v51, %v1542_v7 }
 0x1a9   : > { %v1657_v33 = vpop.f32.mrf.mxu0 }
 0x1aa   : > { %1708 = vst [vmem:[%s2301_s4 + $0x28] sm:$0xff] %v1692_v46  ;;  %v1723_v32 = vadd.f32 %v1722_v13, %v1692_v46  ;;  %v1745_v60 = vmul.f32 %v1692_v46, %v1692_v46 }
 0x1ab   : > { %v1357_v57 = vpop.f32.mrf.mxu2 }
 0x1ac   : > { %v1760_v15 = vadd.f32 %v1759_v26, %v1745_v60  ;;  %v1393_v0 = vadd.f32 %v1357_v57, %v1242_v31 }
 0x1ad   : > { %v1209_v47 = vpop.f32.mrf.mxu1  ;;  %v1507_v29 = vpop.f32.mrf.mxu3 }
 0x1ae   : > { %v1543_v1 = vadd.f32 %v1507_v29, %v1393_v0  ;;  %v1243_v30 = vadd.f32 %v1209_v47, %v2778_v5 }
 0x1b0   : > { %v1693_v53 = vadd.f32 %v1657_v33, %v1543_v1 }
 0x1b1   : > { %v1660_v37 = vpop.f32.mrf.mxu0 }
 0x1b2   : > { %1709 = vst [vmem:[%s2301_s4 + $0x30] sm:$0xff] %v1693_v53  ;;  %v1724_v40 = vadd.f32 %v1723_v32, %v1693_v53  ;;  %v1746_v43 = vmul.f32 %v1693_v53, %v1693_v53 }
 0x1b3   : > { %v1360_v8 = vpop.f32.mrf.mxu2 }
 0x1b4   : > { %v1761_v16 = vadd.f32 %v1760_v15, %v1746_v43  ;;  %v1394_v9 = vadd.f32 %v1360_v8, %v1243_v30 }
 0x1b5   : > { %v1212_v17 = vpop.f32.mrf.mxu1  ;;  %v1510_v63 = vpop.f32.mrf.mxu3 }
 0x1b6   : > { %v1544_v55 = vadd.f32 %v1510_v63, %v1394_v9  ;;  %v1244_v42 = vadd.f32 %v1212_v17, %v2789_v58 }
 0x1b8   : > { %v1694_v35 = vadd.f32 %v1660_v37, %v1544_v55 }
 0x1b9   : > { %v1663_v54 = vpop.f32.mrf.mxu0 }
 0x1ba   : > { %1710 = vst [vmem:[%s2301_s4 + $0x38] sm:$0xff] %v1694_v35  ;;  %v1725_v50 = vadd.f32 %v1724_v40, %v1694_v35  ;;  %v1747_v36 = vmul.f32 %v1694_v35, %v1694_v35 }
 0x1bb   : > { %v1363_v4 = vpop.f32.mrf.mxu2 }
 0x1bc   : > { %v1762_v18 = vadd.f32 %v1761_v16, %v1747_v36  ;;  %v1395_v5 = vadd.f32 %v1363_v4, %v1244_v42 }
 0x1bd   : > { %v1215_v3 = vpop.f32.mrf.mxu1  ;;  %v1513_v19 = vpop.f32.mrf.mxu3 }
 0x1be   : > { %v1545_v59 = vadd.f32 %v1513_v19, %v1395_v5  ;;  %v1245_v10 = vadd.f32 %v1215_v3, %v2800_v61 }
 0x1c0   : > { %v1695_v45 = vadd.f32 %v1663_v54, %v1545_v59 }
 0x1c1   : > { %v1666_v38 = vpop.f32.mrf.mxu0 }
 0x1c2   : > { %1711 = vst [vmem:[%s2301_s4 + $0x40] sm:$0xff] %v1695_v45  ;;  %v1726_v11 = vadd.f32 %v1725_v50, %v1695_v45  ;;  %v1748_v20 = vmul.f32 %v1695_v45, %v1695_v45 }
 0x1c3   : > { %v1366_v41 = vpop.f32.mrf.mxu2 }
 0x1c4   : > { %v1763_v28 = vadd.f32 %v1762_v18, %v1748_v20  ;;  %v1396_v58 = vadd.f32 %v1366_v41, %v1245_v10 }
 0x1c5   : > { %v1218_v52 = vpop.f32.mrf.mxu1  ;;  %v1516_v27 = vpop.f32.mrf.mxu3 }
 0x1c6   : > { %v1546_v62 = vadd.f32 %v1516_v27, %v1396_v58  ;;  %v1246_v23 = vadd.f32 %v1218_v52, %v2811_v24 }
 0x1c8   : > { %v1696_v48 = vadd.f32 %v1666_v38, %v1546_v62 }
 0x1c9   : > { %v1669_v22 = vpop.f32.mrf.mxu0 }
 0x1ca   : > { %1712 = vst [vmem:[%s2301_s4 + $0x48] sm:$0xff] %v1696_v48  ;;  %v1727_v51 = vadd.f32 %v1726_v11, %v1696_v48  ;;  %v1749_v34 = vmul.f32 %v1696_v48, %v1696_v48 }
 0x1cb   : > { %v1369_v13 = vpop.f32.mrf.mxu2 }
 0x1cc   : > { %v1764_v39 = vadd.f32 %v1763_v28, %v1749_v34  ;;  %v1397_v61 = vadd.f32 %v1369_v13, %v1246_v23 }
 0x1cd   : > { %v1221_v25 = vpop.f32.mrf.mxu1  ;;  %v1519_v26 = vpop.f32.mrf.mxu3 }
 0x1ce   : > { %v1547_v6 = vadd.f32 %v1519_v26, %v1397_v61  ;;  %v1247_v7 = vadd.f32 %v1221_v25, %v2822_v14 }
 0x1d0   : > { %v1697_v56 = vadd.f32 %v1669_v22, %v1547_v6 }
 0x1d1   : > { %v1672_v44 = vpop.f32.mrf.mxu0 }
 0x1d2   : > { %1713 = vst [vmem:[%s2301_s4 + $0x50] sm:$0xff] %v1697_v56  ;;  %v1728_v46 = vadd.f32 %v1727_v51, %v1697_v56  ;;  %v1750_v33 = vmul.f32 %v1697_v56, %v1697_v56 }
 0x1d3   : > { %v1372_v31 = vpop.f32.mrf.mxu2 }
 0x1d4   : > { %v1765_v32 = vadd.f32 %v1764_v39, %v1750_v33  ;;  %v1398_v24 = vadd.f32 %v1372_v31, %v1247_v7 }
 0x1d5   : > { %v1224_v60 = vpop.f32.mrf.mxu1  ;;  %v1522_v57 = vpop.f32.mrf.mxu3 }
 0x1d6   : > { %v1548_v15 = vadd.f32 %v1522_v57, %v1398_v24  ;;  %v1248_v29 = vadd.f32 %v1224_v60, %v2832_v2 }
 0x1d8   : > { %v1698_v0 = vadd.f32 %v1672_v44, %v1548_v15 }
 0x1d9   : > { %v1675_v47 = vpop.f32.mrf.mxu0 }
 0x1da   : > { %1714 = vst [vmem:[%s2301_s4 + $0x58] sm:$0xff] %v1698_v0  ;;  %v1729_v1 = vadd.f32 %v1728_v46, %v1698_v0  ;;  %v1751_v53 = vmul.f32 %v1698_v0, %v1698_v0 }
 0x1db   : > { %v1375_v37 = vpop.f32.mrf.mxu2 }
 0x1dc   : > { %v1766_v30 = vadd.f32 %v1765_v32, %v1751_v53  ;;  %v1399_v14 = vadd.f32 %v1375_v37, %v1248_v29 }
 0x1dd   : > { %v1227_v40 = vpop.f32.mrf.mxu1  ;;  %v1525_v43 = vpop.f32.mrf.mxu3 }
 0x1de   : > { %v1549_v8 = vadd.f32 %v1525_v43, %v1399_v14  ;;  %v1249_v17 = vadd.f32 %v1227_v40, %v2842_v49 }
 0x1e0   : > { %v1699_v16 = vadd.f32 %v1675_v47, %v1549_v8 }
 0x1e1   : > { %v1678_v9 = vpop.f32.mrf.mxu0 }
 0x1e2   : > { %1715 = vst [vmem:[%s2301_s4 + $0x60] sm:$0xff] %v1699_v16  ;;  %v1730_v63 = vadd.f32 %v1729_v1, %v1699_v16  ;;  %v1752_v55 = vmul.f32 %v1699_v16, %v1699_v16 }
 0x1e3   : > { %v1378_v35 = vpop.f32.mrf.mxu2 }
 0x1e4   : > { %v1767_v54 = vadd.f32 %v1766_v30, %v1752_v55  ;;  %v1400_v2 = vadd.f32 %v1378_v35, %v1249_v17 }
 0x1e5   : > { %v1230_v42 = vpop.f32.mrf.mxu1  ;;  %v1528_v50 = vpop.f32.mrf.mxu3 }
 0x1e6   : > { %v1550_v36 = vadd.f32 %v1528_v50, %v1400_v2  ;;  %v1250_v18 = vadd.f32 %v1230_v42, %v2849_v21 }
 0x1e8   : > { %v1700_v4 = vadd.f32 %v1678_v9, %v1550_v36 }
 0x1e9   : > { %v1681_v59 = vpop.f32.mrf.mxu0 }
 0x1ea   : > { %1716 = vst [vmem:[%s2301_s4 + $0x68] sm:$0xff] %v1700_v4  ;;  %v1731_v5 = vadd.f32 %v1730_v63, %v1700_v4  ;;  %v1753_v3 = vmul.f32 %v1700_v4, %v1700_v4 }
 0x1eb   : > { %v1381_v19 = vpop.f32.mrf.mxu2 }
 0x1ec   : > { %v1768_v45 = vadd.f32 %v1767_v54, %v1753_v3  ;;  %v1401_v49 = vadd.f32 %v1381_v19, %v1250_v18 }
 0x1ed   : > { %v1531_v38 = vpop.f32.mrf.mxu3  ;;  %v1233_v11 = vpop.f32.mrf.mxu1 }
 0x1ee   : > { %v1551_v10 = vadd.f32 %v1531_v38, %v1401_v49  ;;  %v1251_v41 = vadd.f32 %v1233_v11, %v2856_v12 }
 0x1f0   : > { %v1701_v20 = vadd.f32 %v1681_v59, %v1551_v10 }
 0x1f1   : > { %v1684_v48 = vpop.f32.mrf.mxu0 }
 0x1f2   : > { %1717 = vst [vmem:[%s2301_s4 + $0x70] sm:$0xff] %v1701_v20  ;;  %v1732_v28 = vadd.f32 %v1731_v5, %v1701_v20  ;;  %v1754_v58 = vmul.f32 %v1701_v20, %v1701_v20 }
 0x1f3   : > { %v1384_v52 = vpop.f32.mrf.mxu2 }
 0x1f4   : > { %v1769_v27 = vadd.f32 %v1768_v45, %v1754_v58  ;;  %v1402_v21 = vadd.f32 %v1384_v52, %v1251_v41 }
 0x1f5   : > { %v1534_v62 = vpop.f32.mrf.mxu3 }
 0x1f6   : > { %v1552_v22 = vadd.f32 %v1534_v62, %v1402_v21 }
 0x1f8   : > { %v1702_v23 = vadd.f32 %v1684_v48, %v1552_v22 }
 0x1fa   : > { %1718 = vst [vmem:[%s2301_s4 + $0x78] sm:$0xff] %v1702_v23  ;;  %v1733_v51 = vadd.f32 %v1732_v28, %v1702_v23  ;;  %v1755_v34 = vmul.f32 %v1702_v23, %v1702_v23 }
 0x1fc   : > { %v1734_v13 = vrot.slane %v1733_v51, 4  ;;  %v1770_v39 = vadd.f32 %v1769_v27, %v1755_v34 }
 0x1fe   : > { %v1735_v61 = vadd.f32 %v1734_v13, %v1733_v51  ;;  %v1771_v25 = vrot.slane %v1770_v39, 4 }
 0x200   : > { %v1736_v26 = vrot.slane %v1735_v61, 2  ;;  %v1772_v12 = vadd.f32 %v1771_v25, %v1770_v39 }
 0x202   : > { %v1737_v6 = vadd.f32 %v1736_v26, %v1735_v61  ;;  %v1773_v56 = vrot.slane %v1772_v12, 2 }
 0x204   : > { %v1738_v44 = vrot.slane %v1737_v6, 1  ;;  %v1774_v7 = vadd.f32 %v1773_v56, %v1772_v12 }
 0x206   : > { %v1775_v46 = vrot.slane %v1774_v7, 1  ;;  %v1739_v33 = vadd.f32 %v1738_v44, %v1737_v6 }
 0x208   : > { %v1776_v31 = vadd.f32 %v1775_v46, %v1774_v7 }
 0x20a   : > { %v1778_v32 = vsel %vm1777_vm3, %v1739_v33, %v1776_v31 }
 0x20b   : > { %1779 = vst [vmem:[%s2314_s11] sm:$0x3] %v1778_v32 }
 0x20c PF: > { %s14_s16 = sadd.s32 1, %s2224_s16   ;;  %s2917_s12 = smov %s2216_s14 }
 0x20d   : > { %p11_p10 = scmp.ge.s32.totalorder %s14_s16, 6   ;;  %s2918_s13 = smov %s2220_s15 }
 0x20e   : > { %s2919_s14 = smov %s2922_s17  ;;  %s2920_s15 = smov %s2926_s18 }
 0x20f   :  { %13 = sbr.rel (!%p11_p10) target bundleno = 3 (0x3), region = 97 }

</bundles_post_ra>
